<compile_context>
chip_gen: v7x
topology: tpu7x:2x2x1
jax: 0.10.0
libtpu: 0.0.40
codegen_flags: <defaults>
</compile_context>

<pallas_src>
import functools
import math

import jax
import jax.numpy as jnp
import numpy as np
from jax.experimental import pallas as pl
from jax.experimental.pallas import tpu as pltpu


# --------------------------------------------------------------------------
# Small platform helpers
# --------------------------------------------------------------------------

_FALLBACK_VMEM_LIMIT = 64 * 1024 * 1024


@functools.lru_cache(maxsize=None)
def _vmem_limit_bytes():
    """Explicit scoped-VMEM budget (default is only 16/32 MiB).

    ~100 MiB on v5e/v6e (128 MiB physical), ~56 MiB on v7x (64 MiB physical).
    """
    try:
        cap = int(pltpu.get_tpu_info().vmem_capacity_bytes)
        return int(min(cap * 7 // 8, 100 * 1024 * 1024))
    except Exception:
        return _FALLBACK_VMEM_LIMIT


@functools.lru_cache(maxsize=None)
def _resident_weight_mode():
    """pipeline_mode for constant-index (weight / bias) blocks.

    Their block index never changes across the grid, so double-buffering only
    doubles their VMEM footprint with zero overlap benefit.  pl.Buffered(1) is
    probed once on a tiny kernel; fall back to default pipelining if rejected.
    """
    try:
        mode = pl.Buffered(buffer_count=1)

        def probe_kernel(x_ref, w_ref, o_ref):
            o_ref[...] = x_ref[...] + w_ref[...]

        x = jnp.arange(16 * 128, dtype=jnp.float32).reshape(16, 128)
        w = jnp.ones((8, 128), jnp.float32)
        out = pl.pallas_call(
            probe_kernel,
            out_shape=jax.ShapeDtypeStruct((16, 128), jnp.float32),
            grid=(2,),
            in_specs=[
                pl.BlockSpec((8, 128), lambda i: (i, 0)),
                pl.BlockSpec((8, 128), lambda i: (0, 0), pipeline_mode=mode),
            ],
            out_specs=pl.BlockSpec((8, 128), lambda i: (i, 0)),
        )(x, w)
        if not np.allclose(np.asarray(out), np.asarray(x) + 1.0):
            return None
        return mode
    except Exception:
        return None


def _wspec(shape):
    """BlockSpec for a VMEM-resident weight/bias (constant block index)."""
    index_map = lambda *_: (0,) * len(shape)
    mode = _resident_weight_mode()
    if mode is None:
        return pl.BlockSpec(shape, index_map)
    return pl.BlockSpec(shape, index_map, pipeline_mode=mode)


# --------------------------------------------------------------------------
# Fused gated cross-modal attention (+ first residual, + input projection)
# --------------------------------------------------------------------------

def _cross_attn_kernel(*refs, num_heads, has_input_proj):
    if has_input_proj:
        (q_in_ref, kv_in_ref,
         wq_ref, bq_ref, wk_ref, bk_ref, wv_ref, bv_ref,
         wo_ref, bo_ref, wg_ref, bg_ref, wp_ref, bp_ref,
         out_ref, attn_ref, k_scr, v_scr) = refs
    else:
        (q_in_ref, kv_in_ref,
         wq_ref, bq_ref, wk_ref, bk_ref, wv_ref, bv_ref,
         wo_ref, bo_ref, wg_ref, bg_ref,
         out_ref, attn_ref, k_scr, v_scr) = refs
        wp_ref = bp_ref = None

    E = wq_ref.shape[1]
    dh = E // num_heads
    scale = 1.0 / math.sqrt(dh)

    # K/V projected once per batch element into VMEM scratch; the scratch
    # persists across the inner ("arbitrary") Lq-tile grid axis.
    @pl.when(pl.program_id(1) == 0)
    def _():
        kv = kv_in_ref[...].astype(jnp.bfloat16)
        k = jnp.dot(kv, wk_ref[...],
                    preferred_element_type=jnp.float32) + bk_ref[...]
        v = jnp.dot(kv, wv_ref[...],
                    preferred_element_type=jnp.float32) + bv_ref[...]
        k_scr[...] = k.astype(k_scr.dtype)
        v_scr[...] = v.astype(v_scr.dtype)

    x_q = q_in_ref[...]
    q_bf = x_q.astype(jnp.bfloat16)
    # 1/sqrt(dh) folded into Q ([tq, E] scale instead of per-head [tq, Lk]).
    q = (jnp.dot(q_bf, wq_ref[...],
                 preferred_element_type=jnp.float32) + bq_ref[...]) * scale
    q = q.astype(jnp.bfloat16)

    k_all = k_scr[...]
    v_all = v_scr[...]
    wo = wo_ref[...]
    tq = q.shape[0]
    lk = k_all.shape[0]

    attn_acc = jnp.zeros((tq, lk), jnp.float32)
    proj_acc = jnp.zeros((tq, E), jnp.float32)
    for h in range(num_heads):                       # static unroll over heads
        sl = slice(h * dh, (h + 1) * dh)
        # Contract on last dims -> MXU consumes K directly (no in-kernel k.T).
        s = jax.lax.dot_general(q[:, sl], k_all[:, sl],
                                (((1,), (1,)), ((), ())),
                                preferred_element_type=jnp.float32)
        s = s - jnp.max(s, axis=-1, keepdims=True)
        p = jnp.exp(s)
        # Exact normalization: the head-mean attention map is a module output.
        p = p / jnp.sum(p, axis=-1, keepdims=True)
        attn_acc = attn_acc + p
        oh = jnp.dot(p.astype(jnp.bfloat16), v_all[:, sl],
                     preferred_element_type=jnp.float32)
        # Wo folded into the head loop -> single lane-dense [tq, E] accumulator.
        proj_acc = proj_acc + jnp.dot(oh.astype(jnp.bfloat16), wo[sl, :],
                                      preferred_element_type=jnp.float32)

    # Head-mean attention weights (no [H, Lq, Lk] materialization in HBM).
    attn_ref[...] = (attn_acc * (1.0 / num_heads)).astype(attn_ref.dtype)

    # TODO(synk): GatedCrossModalAttention is not defined in the reference
    # file; implemented as MHA + output projection with a learned sigmoid gate
    # computed from the projected output; attention map = mean over heads.
    proj = proj_acc + bo_ref[...]
    gate = jax.nn.sigmoid(
        jnp.dot(proj.astype(jnp.bfloat16), wg_ref[...],
                preferred_element_type=jnp.float32) + bg_ref[...])

    # Fused residual path: input_proj(q_in) (or identity) + gated update.
    if has_input_proj:
        res = (jnp.dot(q_bf, wp_ref[...],
                       preferred_element_type=jnp.float32) + bp_ref[...])
    else:
        res = x_q.astype(jnp.float32)
    out_ref[...] = (res + gate * proj).astype(out_ref.dtype)


def gated_cross_modal_attention(params, query, key_feats, input_proj,
                                num_heads, *, q_block=256,
                                attn_dtype=jnp.float32):
    """Fused Q/K/V projections, per-head softmax attention, output projection
    + sigmoid gate, fused input projection and first residual.

    query:      [B, Lq, Dq]  (UN-projected features, as in the reference)
    key_feats:  [B, Lk, Dk]
    input_proj: optional (w, b) of the module's input projection (residual
                path), fused into the kernel; Identity when None.
    Returns (out [B, Lq, E], head-mean attention [B, Lq, Lk]).
    """
    B, Lq, Dq = query.shape
    _, Lk, Dk = key_feats.shape
    wq, bq = params["wq"]
    wk, bk = params["wk"]
    wv, bv = params["wv"]
    wo, bo = params["wo"]
    wg, bg = params["wg"]
    E = wq.shape[1]
    has_proj = input_proj is not None

    tq = Lq if Lq <= q_block else q_block
    grid = (B, pl.cdiv(Lq, tq))

    bf16 = jnp.bfloat16
    operands = [
        query, key_feats,
        wq.astype(bf16), bq.reshape(1, E),
        wk.astype(bf16), bk.reshape(1, E),
        wv.astype(bf16), bv.reshape(1, E),
        wo.astype(bf16), bo.reshape(1, E),
        wg.astype(bf16), bg.reshape(1, E),
    ]
    in_specs = [
        pl.BlockSpec((None, tq, Dq), lambda b, qi: (b, qi, 0)),
        pl.BlockSpec((None, Lk, Dk), lambda b, qi: (b, 0, 0)),
        _wspec((Dq, E)), _wspec((1, E)),
        _wspec((Dk, E)), _wspec((1, E)),
        _wspec((Dk, E)), _wspec((1, E)),
        _wspec((E, E)), _wspec((1, E)),
        _wspec((E, E)), _wspec((1, E)),
    ]
    if has_proj:
        wp, bp = input_proj
        operands += [wp.astype(bf16), bp.reshape(1, E)]
        in_specs += [_wspec((Dq, E)), _wspec((1, E))]

    kernel = functools.partial(_cross_attn_kernel, num_heads=num_heads,
                               has_input_proj=has_proj)
    flops = 2 * B * (Lq * Dq * E + 2 * Lk * Dk * E + 2 * Lq * Lk * E
                     + 2 * Lq * E * E + (Lq * Dq * E if has_proj else 0))
    bytes_acc = (4 * B * (Lq * Dq + Lk * Dk + Lq * E + Lq * Lk)
                 + 2 * (Dq * E + 2 * Dk * E + 2 * E * E
                        + (Dq * E if has_proj else 0)) + 4 * 6 * E)

    out, attn = pl.pallas_call(
        kernel,
        out_shape=(
            jax.ShapeDtypeStruct((B, Lq, E), query.dtype),
            # TODO(synk): could be written bf16 to halve the attn-map HBM
            # writeback at long sequences; kept f32 to match reference dtype.
            jax.ShapeDtypeStruct((B, Lq, Lk), attn_dtype),
        ),
        grid=grid,
        in_specs=in_specs,
        out_specs=(
            pl.BlockSpec((None, tq, E), lambda b, qi: (b, qi, 0)),
            pl.BlockSpec((None, tq, Lk), lambda b, qi: (b, qi, 0)),
        ),
        scratch_shapes=[
            pltpu.VMEM((Lk, E), jnp.bfloat16),   # projected K (per batch elem)
            pltpu.VMEM((Lk, E), jnp.bfloat16),   # projected V
        ],
        compiler_params=pltpu.CompilerParams(
            dimension_semantics=("parallel", "arbitrary"),
            vmem_limit_bytes=_vmem_limit_bytes()),
        cost_estimate=pl.CostEstimate(
            flops=int(flops),
            transcendentals=int(B * (num_heads * Lq * Lk + Lq * E)),
            bytes_accessed=int(bytes_acc)),
    )(*operands)
    return out, attn


# --------------------------------------------------------------------------
# Fused FFN block: y = x + Linear2(GELU(Linear1(LayerNorm(x))))
# (hidden 4E dim is K-tiled with an accumulator; dropout = eval no-op)
# --------------------------------------------------------------------------

def _ffn_kernel(x_ref, g_ref, beta_ref, w1_ref, b1_ref, w2_ref, b2_ref,
                o_ref, xn_scr, acc_scr):
    kt = pl.program_id(1)

    @pl.when(kt == 0)
    def _():
        x = x_ref[...].astype(jnp.float32)
        mu = jnp.mean(x, axis=-1, keepdims=True)
        var = jnp.mean(jnp.square(x - mu), axis=-1, keepdims=True)
        xn = (x - mu) * jax.lax.rsqrt(var + 1e-5)
        xn = xn * g_ref[...] + beta_ref[...]
        xn_scr[...] = xn.astype(xn_scr.dtype)     # bf16 MXU operand, cached
        acc_scr[...] = jnp.zeros_like(acc_scr)

    h = (jnp.dot(xn_scr[...], w1_ref[...],
                 preferred_element_type=jnp.float32) + b1_ref[...])
    # TODO(synk): nn.GELU() defaults to the exact erf-based GELU; tanh
    # approximation used here for robust Mosaic lowering (tiny numeric drift).
    h = jax.nn.gelu(h, approximate=True)
    acc_scr[...] += jnp.dot(h.astype(jnp.bfloat16), w2_ref[...],
                            preferred_element_type=jnp.float32)

    @pl.when(kt == pl.num_programs(1) - 1)
    def _():
        y = acc_scr[...] + b2_ref[...]
        o_ref[...] = (x_ref[...].astype(jnp.float32) + y).astype(o_ref.dtype)


def feed_forward_residual(x, gamma, beta, w1, b1, w2, b2,
                          *, block_rows=1024, block_hidden=2048):
    N, E = x.shape
    H = w1.shape[1]
    tm = N if N <= block_rows else block_rows
    th = H if H <= block_hidden else block_hidden
    grid = (pl.cdiv(N, tm), pl.cdiv(H, th))
    bf16 = jnp.bfloat16
    return pl.pallas_call(
        _ffn_kernel,
        out_shape=jax.ShapeDtypeStruct((N, E), x.dtype),
        grid=grid,
        in_specs=[
            pl.BlockSpec((tm, E), lambda i, k: (i, 0)),
            _wspec((1, E)), _wspec((1, E)),
            pl.BlockSpec((E, th), lambda i, k: (0, k)),   # streamed over k
            pl.BlockSpec((1, th), lambda i, k: (0, k)),
            pl.BlockSpec((th, E), lambda i, k: (k, 0)),   # streamed over k
            _wspec((1, E)),
        ],
        out_specs=pl.BlockSpec((tm, E), lambda i, k: (i, 0)),
        scratch_shapes=[
            pltpu.VMEM((tm, E), jnp.bfloat16),   # LayerNorm(x), cached at k==0
            pltpu.VMEM((tm, E), jnp.float32),    # hidden-dim accumulator
        ],
        compiler_params=pltpu.CompilerParams(
            dimension_semantics=("parallel", "arbitrary"),
            vmem_limit_bytes=_vmem_limit_bytes()),
        cost_estimate=pl.CostEstimate(
            flops=int(4 * N * E * H),
            transcendentals=int(N * H),
            bytes_accessed=int(4 * 2 * N * E + 2 * 2 * E * H + 2 * H + 16 * E)),
    )(x, gamma.reshape(1, E), beta.reshape(1, E),
      w1.astype(bf16), b1.reshape(1, H),
      w2.astype(bf16), b2.reshape(1, E))


# --------------------------------------------------------------------------
# Parameter init (deterministic, PyTorch-Linear-style uniform bounds)
# --------------------------------------------------------------------------

def _init_linear(key, din, dout, *, w_dtype=jnp.bfloat16):
    """nn.Linear-style init; weights stored bf16 (MXU operands), biases f32
    (added onto f32 accumulators)."""
    kw, kb = jax.random.split(key)
    bound = 1.0 / math.sqrt(din)
    w = jax.random.uniform(kw, (din, dout), jnp.float32, -bound, bound)
    b = jax.random.uniform(kb, (dout,), jnp.float32, -bound, bound)
    return w.astype(w_dtype), b


def init_gated_cross_attn(key, query_dim, key_dim, embed_dim):
    ks = jax.random.split(key, 5)
    return dict(
        wq=_init_linear(ks[0], query_dim, embed_dim),
        wk=_init_linear(ks[1], key_dim, embed_dim),
        wv=_init_linear(ks[2], key_dim, embed_dim),
        wo=_init_linear(ks[3], embed_dim, embed_dim),
        wg=_init_linear(ks[4], embed_dim, embed_dim),
    )


def init_bidirectional(key, vision_dim, text_dim, fusion_dim):
    ks = jax.random.split(key, 8)

    def ff_params(k1, k2):
        return dict(
            gamma=jnp.ones((fusion_dim,), jnp.float32),
            beta=jnp.zeros((fusion_dim,), jnp.float32),
            w1=_init_linear(k1, fusion_dim, 4 * fusion_dim),
            w2=_init_linear(k2, 4 * fusion_dim, fusion_dim),
        )

    return dict(
        t2v=init_gated_cross_attn(ks[0], text_dim, vision_dim, fusion_dim),
        v2t=init_gated_cross_attn(ks[1], vision_dim, text_dim, fusion_dim),
        vision_ff=ff_params(ks[2], ks[3]),
        text_ff=ff_params(ks[4], ks[5]),
        vision_input_proj=(None if vision_dim == fusion_dim
                           else _init_linear(ks[6], vision_dim, fusion_dim)),
        text_input_proj=(None if text_dim == fusion_dim
                         else _init_linear(ks[7], text_dim, fusion_dim)),
    )


# --------------------------------------------------------------------------
# Module forward
# --------------------------------------------------------------------------

def bidirectional_cross_attention(params, vision_features, text_features,
                                  vision_mask=None, text_mask=None,
                                  num_heads=8):
    B, Lv, _ = vision_features.shape
    Lt = text_features.shape[1]
    E = params["vision_ff"]["gamma"].shape[0]

    # NOTE: when both masks are given the reference module builds all-True
    # attention masks (a no-op on attention), so they never change the math;
    # dropout is an inference-mode no-op.
    del vision_mask, text_mask

    # Attention consumes the UN-projected features (as in the reference); the
    # input projections feed only the residual and are fused into the kernel.
    text_feats, t2v_attn = gated_cross_modal_attention(
        params["t2v"], text_features, vision_features,
        params["text_input_proj"], num_heads)
    vision_feats, v2t_attn = gated_cross_modal_attention(
        params["v2t"], vision_features, text_features,
        params["vision_input_proj"], num_heads)

    tf = params["text_ff"]
    text_feats = feed_forward_residual(
        text_feats.reshape(B * Lt, E), tf["gamma"], tf["beta"],
        tf["w1"][0], tf["w1"][1], tf["w2"][0], tf["w2"][1]).reshape(B, Lt, E)
    vf = params["vision_ff"]
    vision_feats = feed_forward_residual(
        vision_feats.reshape(B * Lv, E), vf["gamma"], vf["beta"],
        vf["w1"][0], vf["w1"][1], vf["w2"][0], vf["w2"][1]).reshape(B, Lv, E)

    return dict(
        vision_features=vision_feats,
        text_features=text_feats,
        vision_to_text_attn=v2t_attn,   # [B, Lv, Lt]
        text_to_vision_attn=t2v_attn,   # [B, Lt, Lv]
    )


# --------------------------------------------------------------------------

if __name__ == "__main__":
    key = jax.random.PRNGKey(0)
    B, Lv, Lt = 2, 16, 8
    vision_dim, text_dim, fusion_dim, num_heads = 32, 24, 32, 4

    kp, kvis, ktxt = jax.random.split(key, 3)
    params = init_bidirectional(kp, vision_dim, text_dim, fusion_dim)
    vision_features = jax.random.normal(kvis, (B, Lv, vision_dim), jnp.float32)
    text_features = jax.random.normal(ktxt, (B, Lt, text_dim), jnp.float32)

    out = bidirectional_cross_attention(params, vision_features, text_features,
                                        num_heads=num_heads)
    jax.block_until_ready(out)

    assert out["vision_features"].shape == (B, Lv, fusion_dim)
    assert out["text_features"].shape == (B, Lt, fusion_dim)
    assert out["vision_to_text_attn"].shape == (B, Lv, Lt)
    assert out["text_to_vision_attn"].shape == (B, Lt, Lv)
    assert all(bool(jnp.all(jnp.isfinite(v))) for v in out.values())
    # Rows of the returned (head-mean) attention maps sum to 1.
    assert bool(jnp.allclose(out["text_to_vision_attn"].sum(-1), 1.0, atol=1e-3))
    assert bool(jnp.allclose(out["vision_to_text_attn"].sum(-1), 1.0, atol=1e-3))
    print("KERNEL_OK")
</pallas_src>

<mosaic_0001>
module attributes {stable_mosaic.version = 11 : i64} {
  func.func @probe_kernel(%arg0: i32, %arg1: memref<8x128xf32, #tpu.memory_space<vmem>>, %arg2: memref<8x128xf32, #tpu.memory_space<vmem>>, %arg3: memref<8x128xf32, #tpu.memory_space<vmem>>) attributes {dimension_semantics = [#tpu.dimension_semantics<arbitrary>], iteration_bounds = array<i64: 2>, scalar_prefetch = 0 : i64, scratch_operands = 0 : i64, tpu.core_type = #tpu.core_type<tc>, window_params = [{transform_indices = @transform_0, window_bounds = array<i64: 8, 128>}, {pipeline_mode = #tpu.pipeline_mode<synchronous>, transform_indices = @transform_1, window_bounds = array<i64: 8, 128>}, {transform_indices = @transform_2, window_bounds = array<i64: 8, 128>}]} {
    %c0 = arith.constant 0 : index
    %c0_0 = arith.constant 0 : index
    %0 = vector.load %arg1[%c0, %c0_0] : memref<8x128xf32, #tpu.memory_space<vmem>>, vector<8x128xf32>
    %c0_1 = arith.constant 0 : index
    %c0_2 = arith.constant 0 : index
    %1 = vector.load %arg2[%c0_1, %c0_2] : memref<8x128xf32, #tpu.memory_space<vmem>>, vector<8x128xf32>
    %2 = arith.addf %0, %1 : vector<8x128xf32>
    %c0_3 = arith.constant 0 : index
    %c0_4 = arith.constant 0 : index
    %3 = vector.load %arg3[%c0_3, %c0_4] : memref<8x128xf32, #tpu.memory_space<vmem>>, vector<8x128xf32>
    tpu.vector_store %arg3[%c0_3, %c0_4], %2 {strides = array<i32>} : memref<8x128xf32, #tpu.memory_space<vmem>>, vector<8x128xf32>,
    return
  }
  func.func @transform_0(%arg0: i32) -> (i32, i32) {
    %c0_i32 = arith.constant 0 : i32
    %c0_i32_0 = arith.constant 0 : i32
    return %arg0, %c0_i32 : i32, i32
  }
  func.func @transform_1(%arg0: i32) -> (i32, i32) {
    %c0_i32 = arith.constant 0 : i32
    %c0_i32_0 = arith.constant 0 : i32
    %c0_i32_1 = arith.constant 0 : i32
    return %c0_i32, %c0_i32_0 : i32, i32
  }
  func.func @transform_2(%arg0: i32) -> (i32, i32) {
    %c0_i32 = arith.constant 0 : i32
    %c0_i32_0 = arith.constant 0 : i32
    return %arg0, %c0_i32 : i32, i32
  }
}

module attributes {stable_mosaic.version = 11 : i64} {
  func.func @_cross_attn_kernel(%arg0: i32, %arg1: i32, %arg2: memref<1x8x24xf32, #tpu.memory_space<vmem>>, %arg3: memref<1x16x32xf32, #tpu.memory_space<vmem>>, %arg4: memref<24x32xbf16, #tpu.memory_space<vmem>>, %arg5: memref<1x32xf32, #tpu.memory_space<vmem>>, %arg6: memref<32x32xbf16, #tpu.memory_space<vmem>>, %arg7: memref<1x32xf32, #tpu.memory_space<vmem>>, %arg8: memref<32x32xbf16, #tpu.memory_space<vmem>>, %arg9: memref<1x32xf32, #tpu.memory_space<vmem>>, %arg10: memref<32x32xbf16, #tpu.memory_space<vmem>>, %arg11: memref<1x32xf32, #tpu.memory_space<vmem>>, %arg12: memref<32x32xbf16, #tpu.memory_space<vmem>>, %arg13: memref<1x32xf32, #tpu.memory_space<vmem>>, %arg14: memref<24x32xbf16, #tpu.memory_space<vmem>>, %arg15: memref<1x32xf32, #tpu.memory_space<vmem>>, %arg16: memref<1x8x32xf32, #tpu.memory_space<vmem>>, %arg17: memref<1x8x16xf32, #tpu.memory_space<vmem>>, %arg18: memref<16x32xbf16, #tpu.memory_space<vmem>>, %arg19: memref<16x32xbf16, #tpu.memory_space<vmem>>) attributes {dimension_semantics = [#tpu.dimension_semantics<parallel>, #tpu.dimension_semantics<arbitrary>], iteration_bounds = array<i64: 2, 1>, scalar_prefetch = 0 : i64, scratch_operands = 2 : i64, tpu.core_type = #tpu.core_type<tc>, window_params = [{transform_indices = @transform_0, window_bounds = array<i64: 1, 8, 24>}, {transform_indices = @transform_1, window_bounds = array<i64: 1, 16, 32>}, {pipeline_mode = #tpu.pipeline_mode<synchronous>, transform_indices = @transform_2, window_bounds = array<i64: 24, 32>}, {pipeline_mode = #tpu.pipeline_mode<synchronous>, transform_indices = @transform_3, window_bounds = array<i64: 1, 32>}, {pipeline_mode = #tpu.pipeline_mode<synchronous>, transform_indices = @transform_4, window_bounds = array<i64: 32, 32>}, {pipeline_mode = #tpu.pipeline_mode<synchronous>, transform_indices = @transform_5, window_bounds = array<i64: 1, 32>}, {pipeline_mode = #tpu.pipeline_mode<synchronous>, transform_indices = @transform_6, window_bounds = array<i64: 32, 32>}, {pipeline_mode = #tpu.pipeline_mode<synchronous>, transform_indices = @transform_7, window_bounds = array<i64: 1, 32>}, {pipeline_mode = #tpu.pipeline_mode<synchronous>, transform_indices = @transform_8, window_bounds = array<i64: 32, 32>}, {pipeline_mode = #tpu.pipeline_mode<synchronous>, transform_indices = @transform_9, window_bounds = array<i64: 1, 32>}, {pipeline_mode = #tpu.pipeline_mode<synchronous>, transform_indices = @transform_10, window_bounds = array<i64: 32, 32>}, {pipeline_mode = #tpu.pipeline_mode<synchronous>, transform_indices = @transform_11, window_bounds = array<i64: 1, 32>}, {pipeline_mode = #tpu.pipeline_mode<synchronous>, transform_indices = @transform_12, window_bounds = array<i64: 24, 32>}, {pipeline_mode = #tpu.pipeline_mode<synchronous>, transform_indices = @transform_13, window_bounds = array<i64: 1, 32>}, {transform_indices = @transform_14, window_bounds = array<i64: 1, 8, 32>}, {transform_indices = @transform_15, window_bounds = array<i64: 1, 8, 16>}]} {
    %c0_i32 = arith.constant 0 : i32
    %0 = arith.cmpi eq, %arg1, %c0_i32 : i32
    %1 = arith.extui %0 : i1 to i32
    %c0_i32_0 = arith.constant 0 : i32
    %2 = arith.cmpi ne, %1, %c0_i32_0 : i32
    scf.if %2 {
      %c0_56 = arith.constant 0 : index
      %c0_57 = arith.constant 0 : index
      %c0_58 = arith.constant 0 : index
      %128 = vector.load %arg3[%c0_56, %c0_57, %c0_58] : memref<1x16x32xf32, #tpu.memory_space<vmem>>, vector<1x16x32xf32>
      %129 = vector.shape_cast %128 : vector<1x16x32xf32> to vector<16x32xf32>
      %130 = arith.truncf %129 : vector<16x32xf32> to vector<16x32xbf16>
      %c0_59 = arith.constant 0 : index
      %c0_60 = arith.constant 0 : index
      %131 = vector.load %arg6[%c0_59, %c0_60] : memref<32x32xbf16, #tpu.memory_space<vmem>>, vector<32x32xbf16>
      %cst_61 = arith.constant dense<0.000000e+00> : vector<16x32xf32>
      %132 = tpu.matmul %130, %131, %cst_61 {dimension_numbers = #tpu.dot_dimension_numbers<[1], [0], [0], [1], [0, 0, 1, 1], [], []>} : vector<16x32xbf16>, vector<32x32xbf16>, vector<16x32xf32> -> vector<16x32xf32>
      %c0_62 = arith.constant 0 : index
      %c0_63 = arith.constant 0 : index
      %133 = vector.load %arg7[%c0_62, %c0_63] : memref<1x32xf32, #tpu.memory_space<vmem>>, vector<1x32xf32>
      %134 = vector.broadcast %133 : vector<1x32xf32> to vector<16x32xf32>
      %135 = arith.addf %132, %134 : vector<16x32xf32>
      %c0_64 = arith.constant 0 : index
      %c0_65 = arith.constant 0 : index
      %136 = vector.load %arg8[%c0_64, %c0_65] : memref<32x32xbf16, #tpu.memory_space<vmem>>, vector<32x32xbf16>
      %cst_66 = arith.constant dense<0.000000e+00> : vector<16x32xf32>
      %137 = tpu.matmul %130, %136, %cst_66 {dimension_numbers = #tpu.dot_dimension_numbers<[1], [0], [0], [1], [0, 0, 1, 1], [], []>} : vector<16x32xbf16>, vector<32x32xbf16>, vector<16x32xf32> -> vector<16x32xf32>
      %c0_67 = arith.constant 0 : index
      %c0_68 = arith.constant 0 : index
      %138 = vector.load %arg9[%c0_67, %c0_68] : memref<1x32xf32, #tpu.memory_space<vmem>>, vector<1x32xf32>
      %139 = vector.broadcast %138 : vector<1x32xf32> to vector<16x32xf32>
      %140 = arith.addf %137, %139 : vector<16x32xf32>
      %141 = arith.truncf %135 : vector<16x32xf32> to vector<16x32xbf16>
      %c0_69 = arith.constant 0 : index
      %c0_70 = arith.constant 0 : index
      %142 = vector.load %arg18[%c0_69, %c0_70] : memref<16x32xbf16, #tpu.memory_space<vmem>>, vector<16x32xbf16>
      tpu.vector_store %arg18[%c0_69, %c0_70], %141 {strides = array<i32>} : memref<16x32xbf16, #tpu.memory_space<vmem>>, vector<16x32xbf16>,
      %143 = arith.truncf %140 : vector<16x32xf32> to vector<16x32xbf16>
      %c0_71 = arith.constant 0 : index
      %c0_72 = arith.constant 0 : index
      %144 = vector.load %arg19[%c0_71, %c0_72] : memref<16x32xbf16, #tpu.memory_space<vmem>>, vector<16x32xbf16>
      tpu.vector_store %arg19[%c0_71, %c0_72], %143 {strides = array<i32>} : memref<16x32xbf16, #tpu.memory_space<vmem>>, vector<16x32xbf16>,
    } else {
    }
    %c0 = arith.constant 0 : index
    %c0_1 = arith.constant 0 : index
    %c0_2 = arith.constant 0 : index
    %3 = vector.load %arg2[%c0, %c0_1, %c0_2] : memref<1x8x24xf32, #tpu.memory_space<vmem>>, vector<1x8x24xf32>
    %4 = vector.shape_cast %3 : vector<1x8x24xf32> to vector<8x24xf32>
    %5 = arith.truncf %4 : vector<8x24xf32> to vector<8x24xbf16>
    %c0_3 = arith.constant 0 : index
    %c0_4 = arith.constant 0 : index
    %6 = vector.load %arg4[%c0_3, %c0_4] : memref<24x32xbf16, #tpu.memory_space<vmem>>, vector<24x32xbf16>
    %cst = arith.constant dense<0.000000e+00> : vector<8x32xf32>
    %7 = tpu.matmul %5, %6, %cst {dimension_numbers = #tpu.dot_dimension_numbers<[1], [0], [0], [1], [0, 0, 1, 1], [], []>} : vector<8x24xbf16>, vector<24x32xbf16>, vector<8x32xf32> -> vector<8x32xf32>
    %c0_5 = arith.constant 0 : index
    %c0_6 = arith.constant 0 : index
    %8 = vector.load %arg5[%c0_5, %c0_6] : memref<1x32xf32, #tpu.memory_space<vmem>>, vector<1x32xf32>
    %9 = vector.broadcast %8 : vector<1x32xf32> to vector<8x32xf32>
    %10 = arith.addf %7, %9 : vector<8x32xf32>
    %cst_7 = arith.constant 0.353553385 : f32
    %11 = vector.broadcast %cst_7 : f32 to vector<8x32xf32>
    %12 = arith.mulf %10, %11 : vector<8x32xf32>
    %13 = arith.truncf %12 : vector<8x32xf32> to vector<8x32xbf16>
    %c0_8 = arith.constant 0 : index
    %c0_9 = arith.constant 0 : index
    %14 = vector.load %arg18[%c0_8, %c0_9] : memref<16x32xbf16, #tpu.memory_space<vmem>>, vector<16x32xbf16>
    %c0_10 = arith.constant 0 : index
    %c0_11 = arith.constant 0 : index
    %15 = vector.load %arg19[%c0_10, %c0_11] : memref<16x32xbf16, #tpu.memory_space<vmem>>, vector<16x32xbf16>
    %c0_12 = arith.constant 0 : index
    %c0_13 = arith.constant 0 : index
    %16 = vector.load %arg10[%c0_12, %c0_13] : memref<32x32xbf16, #tpu.memory_space<vmem>>, vector<32x32xbf16>
    %cst_14 = arith.constant 0.000000e+00 : f32
    %17 = vector.broadcast %cst_14 : f32 to vector<8x16xf32>
    %cst_15 = arith.constant 0.000000e+00 : f32
    %18 = vector.broadcast %cst_15 : f32 to vector<8x32xf32>
    %19 = vector.extract_strided_slice %13 {offsets = [0, 0], sizes = [8, 8], strides = [1, 1]} : vector<8x32xbf16> to vector<8x8xbf16>
    %20 = vector.extract_strided_slice %14 {offsets = [0, 0], sizes = [16, 8], strides = [1, 1]} : vector<16x32xbf16> to vector<16x8xbf16>
    %cst_16 = arith.constant dense<0.000000e+00> : vector<8x16xf32>
    %21 = tpu.matmul %19, %20, %cst_16 {dimension_numbers = #tpu.dot_dimension_numbers<[1], [1], [0], [0], [0, 0, 1, 0], [], []>} : vector<8x8xbf16>, vector<16x8xbf16>, vector<8x16xf32> -> vector<8x16xf32>
    %cst_17 = arith.constant dense<0xFF800000> : vector<8xf32>
    %22 = vector.multi_reduction <maximumf>, %21, %cst_17 [1] : vector<8x16xf32> to vector<8xf32>
    %23 = vector.shape_cast %22 : vector<8xf32> to vector<8x1xf32>
    %24 = vector.broadcast %23 : vector<8x1xf32> to vector<8x16xf32>
    %25 = arith.subf %21, %24 : vector<8x16xf32>
    %26 = math.exp %25 : vector<8x16xf32>
    %cst_18 = arith.constant dense<0.000000e+00> : vector<8xf32>
    %27 = vector.multi_reduction <add>, %26, %cst_18 [1] : vector<8x16xf32> to vector<8xf32>
    %28 = vector.shape_cast %27 : vector<8xf32> to vector<8x1xf32>
    %29 = vector.broadcast %28 : vector<8x1xf32> to vector<8x16xf32>
    %30 = arith.divf %26, %29 : vector<8x16xf32>
    %31 = arith.addf %17, %30 : vector<8x16xf32>
    %32 = arith.truncf %30 : vector<8x16xf32> to vector<8x16xbf16>
    %33 = vector.extract_strided_slice %15 {offsets = [0, 0], sizes = [16, 8], strides = [1, 1]} : vector<16x32xbf16> to vector<16x8xbf16>
    %cst_19 = arith.constant dense<0.000000e+00> : vector<8x8xf32>
    %34 = tpu.matmul %32, %33, %cst_19 {dimension_numbers = #tpu.dot_dimension_numbers<[1], [0], [0], [1], [0, 0, 1, 1], [], []>} : vector<8x16xbf16>, vector<16x8xbf16>, vector<8x8xf32> -> vector<8x8xf32>
    %35 = arith.truncf %34 : vector<8x8xf32> to vector<8x8xbf16>
    %36 = vector.extract_strided_slice %16 {offsets = [0, 0], sizes = [8, 32], strides = [1, 1]} : vector<32x32xbf16> to vector<8x32xbf16>
    %cst_20 = arith.constant dense<0.000000e+00> : vector<8x32xf32>
    %37 = tpu.matmul %35, %36, %cst_20 {dimension_numbers = #tpu.dot_dimension_numbers<[1], [0], [0], [1], [0, 0, 1, 1], [], []>} : vector<8x8xbf16>, vector<8x32xbf16>, vector<8x32xf32> -> vector<8x32xf32>
    %38 = arith.addf %18, %37 : vector<8x32xf32>
    %39 = vector.extract_strided_slice %13 {offsets = [0, 8], sizes = [8, 8], strides = [1, 1]} : vector<8x32xbf16> to vector<8x8xbf16>
    %40 = vector.extract_strided_slice %14 {offsets = [0, 8], sizes = [16, 8], strides = [1, 1]} : vector<16x32xbf16> to vector<16x8xbf16>
    %cst_21 = arith.constant dense<0.000000e+00> : vector<8x16xf32>
    %41 = tpu.matmul %39, %40, %cst_21 {dimension_numbers = #tpu.dot_dimension_numbers<[1], [1], [0], [0], [0, 0, 1, 0], [], []>} : vector<8x8xbf16>, vector<16x8xbf16>, vector<8x16xf32> -> vector<8x16xf32>
    %cst_22 = arith.constant dense<0xFF800000> : vector<8xf32>
    %42 = vector.multi_reduction <maximumf>, %41, %cst_22 [1] : vector<8x16xf32> to vector<8xf32>
    %43 = vector.shape_cast %42 : vector<8xf32> to vector<8x1xf32>
    %44 = vector.broadcast %43 : vector<8x1xf32> to vector<8x16xf32>
    %45 = arith.subf %41, %44 : vector<8x16xf32>
    %46 = math.exp %45 : vector<8x16xf32>
    %cst_23 = arith.constant dense<0.000000e+00> : vector<8xf32>
    %47 = vector.multi_reduction <add>, %46, %cst_23 [1] : vector<8x16xf32> to vector<8xf32>
    %48 = vector.shape_cast %47 : vector<8xf32> to vector<8x1xf32>
    %49 = vector.broadcast %48 : vector<8x1xf32> to vector<8x16xf32>
    %50 = arith.divf %46, %49 : vector<8x16xf32>
    %51 = arith.addf %31, %50 : vector<8x16xf32>
    %52 = arith.truncf %50 : vector<8x16xf32> to vector<8x16xbf16>
    %53 = vector.extract_strided_slice %15 {offsets = [0, 8], sizes = [16, 8], strides = [1, 1]} : vector<16x32xbf16> to vector<16x8xbf16>
    %cst_24 = arith.constant dense<0.000000e+00> : vector<8x8xf32>
    %54 = tpu.matmul %52, %53, %cst_24 {dimension_numbers = #tpu.dot_dimension_numbers<[1], [0], [0], [1], [0, 0, 1, 1], [], []>} : vector<8x16xbf16>, vector<16x8xbf16>, vector<8x8xf32> -> vector<8x8xf32>
    %55 = arith.truncf %54 : vector<8x8xf32> to vector<8x8xbf16>
    %56 = vector.extract_strided_slice %16 {offsets = [8, 0], sizes = [8, 32], strides = [1, 1]} : vector<32x32xbf16> to vector<8x32xbf16>
    %cst_25 = arith.constant dense<0.000000e+00> : vector<8x32xf32>
    %57 = tpu.matmul %55, %56, %cst_25 {dimension_numbers = #tpu.dot_dimension_numbers<[1], [0], [0], [1], [0, 0, 1, 1], [], []>} : vector<8x8xbf16>, vector<8x32xbf16>, vector<8x32xf32> -> vector<8x32xf32>
    %58 = arith.addf %38, %57 : vector<8x32xf32>
    %59 = vector.extract_strided_slice %13 {offsets = [0, 16], sizes = [8, 8], strides = [1, 1]} : vector<8x32xbf16> to vector<8x8xbf16>
    %60 = vector.extract_strided_slice %14 {offsets = [0, 16], sizes = [16, 8], strides = [1, 1]} : vector<16x32xbf16> to vector<16x8xbf16>
    %cst_26 = arith.constant dense<0.000000e+00> : vector<8x16xf32>
    %61 = tpu.matmul %59, %60, %cst_26 {dimension_numbers = #tpu.dot_dimension_numbers<[1], [1], [0], [0], [0, 0, 1, 0], [], []>} : vector<8x8xbf16>, vector<16x8xbf16>, vector<8x16xf32> -> vector<8x16xf32>
    %cst_27 = arith.constant dense<0xFF800000> : vector<8xf32>
    %62 = vector.multi_reduction <maximumf>, %61, %cst_27 [1] : vector<8x16xf32> to vector<8xf32>
    %63 = vector.shape_cast %62 : vector<8xf32> to vector<8x1xf32>
    %64 = vector.broadcast %63 : vector<8x1xf32> to vector<8x16xf32>
    %65 = arith.subf %61, %64 : vector<8x16xf32>
    %66 = math.exp %65 : vector<8x16xf32>
    %cst_28 = arith.constant dense<0.000000e+00> : vector<8xf32>
    %67 = vector.multi_reduction <add>, %66, %cst_28 [1] : vector<8x16xf32> to vector<8xf32>
    %68 = vector.shape_cast %67 : vector<8xf32> to vector<8x1xf32>
    %69 = vector.broadcast %68 : vector<8x1xf32> to vector<8x16xf32>
    %70 = arith.divf %66, %69 : vector<8x16xf32>
    %71 = arith.addf %51, %70 : vector<8x16xf32>
    %72 = arith.truncf %70 : vector<8x16xf32> to vector<8x16xbf16>
    %73 = vector.extract_strided_slice %15 {offsets = [0, 16], sizes = [16, 8], strides = [1, 1]} : vector<16x32xbf16> to vector<16x8xbf16>
    %cst_29 = arith.constant dense<0.000000e+00> : vector<8x8xf32>
    %74 = tpu.matmul %72, %73, %cst_29 {dimension_numbers = #tpu.dot_dimension_numbers<[1], [0], [0], [1], [0, 0, 1, 1], [], []>} : vector<8x16xbf16>, vector<16x8xbf16>, vector<8x8xf32> -> vector<8x8xf32>
    %75 = arith.truncf %74 : vector<8x8xf32> to vector<8x8xbf16>
    %76 = vector.extract_strided_slice %16 {offsets = [16, 0], sizes = [8, 32], strides = [1, 1]} : vector<32x32xbf16> to vector<8x32xbf16>
    %cst_30 = arith.constant dense<0.000000e+00> : vector<8x32xf32>
    %77 = tpu.matmul %75, %76, %cst_30 {dimension_numbers = #tpu.dot_dimension_numbers<[1], [0], [0], [1], [0, 0, 1, 1], [], []>} : vector<8x8xbf16>, vector<8x32xbf16>, vector<8x32xf32> -> vector<8x32xf32>
    %78 = arith.addf %58, %77 : vector<8x32xf32>
    %79 = vector.extract_strided_slice %13 {offsets = [0, 24], sizes = [8, 8], strides = [1, 1]} : vector<8x32xbf16> to vector<8x8xbf16>
    %80 = vector.extract_strided_slice %14 {offsets = [0, 24], sizes = [16, 8], strides = [1, 1]} : vector<16x32xbf16> to vector<16x8xbf16>
    %cst_31 = arith.constant dense<0.000000e+00> : vector<8x16xf32>
    %81 = tpu.matmul %79, %80, %cst_31 {dimension_numbers = #tpu.dot_dimension_numbers<[1], [1], [0], [0], [0, 0, 1, 0], [], []>} : vector<8x8xbf16>, vector<16x8xbf16>, vector<8x16xf32> -> vector<8x16xf32>
    %cst_32 = arith.constant dense<0xFF800000> : vector<8xf32>
    %82 = vector.multi_reduction <maximumf>, %81, %cst_32 [1] : vector<8x16xf32> to vector<8xf32>
    %83 = vector.shape_cast %82 : vector<8xf32> to vector<8x1xf32>
    %84 = vector.broadcast %83 : vector<8x1xf32> to vector<8x16xf32>
    %85 = arith.subf %81, %84 : vector<8x16xf32>
    %86 = math.exp %85 : vector<8x16xf32>
    %cst_33 = arith.constant dense<0.000000e+00> : vector<8xf32>
    %87 = vector.multi_reduction <add>, %86, %cst_33 [1] : vector<8x16xf32> to vector<8xf32>
    %88 = vector.shape_cast %87 : vector<8xf32> to vector<8x1xf32>
    %89 = vector.broadcast %88 : vector<8x1xf32> to vector<8x16xf32>
    %90 = arith.divf %86, %89 : vector<8x16xf32>
    %91 = arith.addf %71, %90 : vector<8x16xf32>
    %92 = arith.truncf %90 : vector<8x16xf32> to vector<8x16xbf16>
    %93 = vector.extract_strided_slice %15 {offsets = [0, 24], sizes = [16, 8], strides = [1, 1]} : vector<16x32xbf16> to vector<16x8xbf16>
    %cst_34 = arith.constant dense<0.000000e+00> : vector<8x8xf32>
    %94 = tpu.matmul %92, %93, %cst_34 {dimension_numbers = #tpu.dot_dimension_numbers<[1], [0], [0], [1], [0, 0, 1, 1], [], []>} : vector<8x16xbf16>, vector<16x8xbf16>, vector<8x8xf32> -> vector<8x8xf32>
    %95 = arith.truncf %94 : vector<8x8xf32> to vector<8x8xbf16>
    %96 = vector.extract_strided_slice %16 {offsets = [24, 0], sizes = [8, 32], strides = [1, 1]} : vector<32x32xbf16> to vector<8x32xbf16>
    %cst_35 = arith.constant dense<0.000000e+00> : vector<8x32xf32>
    %97 = tpu.matmul %95, %96, %cst_35 {dimension_numbers = #tpu.dot_dimension_numbers<[1], [0], [0], [1], [0, 0, 1, 1], [], []>} : vector<8x8xbf16>, vector<8x32xbf16>, vector<8x32xf32> -> vector<8x32xf32>
    %98 = arith.addf %78, %97 : vector<8x32xf32>
    %cst_36 = arith.constant 2.500000e-01 : f32
    %99 = vector.broadcast %cst_36 : f32 to vector<8x16xf32>
    %100 = arith.mulf %91, %99 : vector<8x16xf32>
    %c0_37 = arith.constant 0 : index
    %c0_38 = arith.constant 0 : index
    %c0_39 = arith.constant 0 : index
    %101 = vector.load %arg17[%c0_37, %c0_38, %c0_39] : memref<1x8x16xf32, #tpu.memory_space<vmem>>, vector<1x8x16xf32>
    %102 = vector.shape_cast %101 : vector<1x8x16xf32> to vector<8x16xf32>
    %103 = vector.shape_cast %100 : vector<8x16xf32> to vector<1x8x16xf32>
    tpu.vector_store %arg17[%c0_37, %c0_38, %c0_39], %103 {strides = array<i32>} : memref<1x8x16xf32, #tpu.memory_space<vmem>>, vector<1x8x16xf32>,
    %c0_40 = arith.constant 0 : index
    %c0_41 = arith.constant 0 : index
    %104 = vector.load %arg11[%c0_40, %c0_41] : memref<1x32xf32, #tpu.memory_space<vmem>>, vector<1x32xf32>
    %105 = vector.broadcast %104 : vector<1x32xf32> to vector<8x32xf32>
    %106 = arith.addf %98, %105 : vector<8x32xf32>
    %107 = arith.truncf %106 : vector<8x32xf32> to vector<8x32xbf16>
    %c0_42 = arith.constant 0 : index
    %c0_43 = arith.constant 0 : index
    %108 = vector.load %arg12[%c0_42, %c0_43] : memref<32x32xbf16, #tpu.memory_space<vmem>>, vector<32x32xbf16>
    %cst_44 = arith.constant dense<0.000000e+00> : vector<8x32xf32>
    %109 = tpu.matmul %107, %108, %cst_44 {dimension_numbers = #tpu.dot_dimension_numbers<[1], [0], [0], [1], [0, 0, 1, 1], [], []>} : vector<8x32xbf16>, vector<32x32xbf16>, vector<8x32xf32> -> vector<8x32xf32>
    %c0_45 = arith.constant 0 : index
    %c0_46 = arith.constant 0 : index
    %110 = vector.load %arg13[%c0_45, %c0_46] : memref<1x32xf32, #tpu.memory_space<vmem>>, vector<1x32xf32>
    %111 = vector.broadcast %110 : vector<1x32xf32> to vector<8x32xf32>
    %112 = arith.addf %109, %111 : vector<8x32xf32>
    %113 = arith.negf %112 : vector<8x32xf32>
    %114 = math.exp %113 : vector<8x32xf32>
    %cst_47 = arith.constant 1.000000e+00 : f32
    %115 = vector.broadcast %cst_47 : f32 to vector<8x32xf32>
    %116 = arith.addf %115, %114 : vector<8x32xf32>
    %117 = arith.divf %115, %116 : vector<8x32xf32>
    %c0_48 = arith.constant 0 : index
    %c0_49 = arith.constant 0 : index
    %118 = vector.load %arg14[%c0_48, %c0_49] : memref<24x32xbf16, #tpu.memory_space<vmem>>, vector<24x32xbf16>
    %cst_50 = arith.constant dense<0.000000e+00> : vector<8x32xf32>
    %119 = tpu.matmul %5, %118, %cst_50 {dimension_numbers = #tpu.dot_dimension_numbers<[1], [0], [0], [1], [0, 0, 1, 1], [], []>} : vector<8x24xbf16>, vector<24x32xbf16>, vector<8x32xf32> -> vector<8x32xf32>
    %c0_51 = arith.constant 0 : index
    %c0_52 = arith.constant 0 : index
    %120 = vector.load %arg15[%c0_51, %c0_52] : memref<1x32xf32, #tpu.memory_space<vmem>>, vector<1x32xf32>
    %121 = vector.broadcast %120 : vector<1x32xf32> to vector<8x32xf32>
    %122 = arith.addf %119, %121 : vector<8x32xf32>
    %123 = arith.mulf %117, %106 : vector<8x32xf32>
    %124 = arith.addf %122, %123 : vector<8x32xf32>
    %c0_53 = arith.constant 0 : index
    %c0_54 = arith.constant 0 : index
    %c0_55 = arith.constant 0 : index
    %125 = vector.load %arg16[%c0_53, %c0_54, %c0_55] : memref<1x8x32xf32, #tpu.memory_space<vmem>>, vector<1x8x32xf32>
    %126 = vector.shape_cast %125 : vector<1x8x32xf32> to vector<8x32xf32>
    %127 = vector.shape_cast %124 : vector<8x32xf32> to vector<1x8x32xf32>
    tpu.vector_store %arg16[%c0_53, %c0_54, %c0_55], %127 {strides = array<i32>} : memref<1x8x32xf32, #tpu.memory_space<vmem>>, vector<1x8x32xf32>,
    return
  }
  func.func @transform_0(%arg0: i32, %arg1: i32) -> (i32, i32, i32) {
    %c0_i32 = arith.constant 0 : i32
    %c0_i32_0 = arith.constant 0 : i32
    return %arg0, %arg1, %c0_i32 : i32, i32, i32
  }
  func.func @transform_1(%arg0: i32, %arg1: i32) -> (i32, i32, i32) {
    %c0_i32 = arith.constant 0 : i32
    %c0_i32_0 = arith.constant 0 : i32
    %c0_i32_1 = arith.constant 0 : i32
    return %arg0, %c0_i32, %c0_i32_0 : i32, i32, i32
  }
  func.func @transform_2(%arg0: i32, %arg1: i32) -> (i32, i32) {
    %c0_i32 = arith.constant 0 : i32
    %c0_i32_0 = arith.constant 0 : i32
    %c0_i32_1 = arith.constant 0 : i32
    return %c0_i32, %c0_i32_0 : i32, i32
  }
  func.func @transform_3(%arg0: i32, %arg1: i32) -> (i32, i32) {
    %c0_i32 = arith.constant 0 : i32
    %c0_i32_0 = arith.constant 0 : i32
    %c0_i32_1 = arith.constant 0 : i32
    return %c0_i32, %c0_i32_0 : i32, i32
  }
  func.func @transform_4(%arg0: i32, %arg1: i32) -> (i32, i32) {
    %c0_i32 = arith.constant 0 : i32
    %c0_i32_0 = arith.constant 0 : i32
    %c0_i32_1 = arith.constant 0 : i32
    return %c0_i32, %c0_i32_0 : i32, i32
  }
  func.func @transform_5(%arg0: i32, %arg1: i32) -> (i32, i32) {
    %c0_i32 = arith.constant 0 : i32
    %c0_i32_0 = arith.constant 0 : i32
    %c0_i32_1 = arith.constant 0 : i32
    return %c0_i32, %c0_i32_0 : i32, i32
  }
  func.func @transform_6(%arg0: i32, %arg1: i32) -> (i32, i32) {
    %c0_i32 = arith.constant 0 : i32
    %c0_i32_0 = arith.constant 0 : i32
    %c0_i32_1 = arith.constant 0 : i32
    return %c0_i32, %c0_i32_0 : i32, i32
  }
  func.func @transform_7(%arg0: i32, %arg1: i32) -> (i32, i32) {
    %c0_i32 = arith.constant 0 : i32
    %c0_i32_0 = arith.constant 0 : i32
    %c0_i32_1 = arith.constant 0 : i32
    return %c0_i32, %c0_i32_0 : i32, i32
  }
  func.func @transform_8(%arg0: i32, %arg1: i32) -> (i32, i32) {
    %c0_i32 = arith.constant 0 : i32
    %c0_i32_0 = arith.constant 0 : i32
    %c0_i32_1 = arith.constant 0 : i32
    return %c0_i32, %c0_i32_0 : i32, i32
  }
  func.func @transform_9(%arg0: i32, %arg1: i32) -> (i32, i32) {
    %c0_i32 = arith.constant 0 : i32
    %c0_i32_0 = arith.constant 0 : i32
    %c0_i32_1 = arith.constant 0 : i32
    return %c0_i32, %c0_i32_0 : i32, i32
  }
  func.func @transform_10(%arg0: i32, %arg1: i32) -> (i32, i32) {
    %c0_i32 = arith.constant 0 : i32
    %c0_i32_0 = arith.constant 0 : i32
    %c0_i32_1 = arith.constant 0 : i32
    return %c0_i32, %c0_i32_0 : i32, i32
  }
  func.func @transform_11(%arg0: i32, %arg1: i32) -> (i32, i32) {
    %c0_i32 = arith.constant 0 : i32
    %c0_i32_0 = arith.constant 0 : i32
    %c0_i32_1 = arith.constant 0 : i32
    return %c0_i32, %c0_i32_0 : i32, i32
  }
  func.func @transform_12(%arg0: i32, %arg1: i32) -> (i32, i32) {
    %c0_i32 = arith.constant 0 : i32
    %c0_i32_0 = arith.constant 0 : i32
    %c0_i32_1 = arith.constant 0 : i32
    return %c0_i32, %c0_i32_0 : i32, i32
  }
  func.func @transform_13(%arg0: i32, %arg1: i32) -> (i32, i32) {
    %c0_i32 = arith.constant 0 : i32
    %c0_i32_0 = arith.constant 0 : i32
    %c0_i32_1 = arith.constant 0 : i32
    return %c0_i32, %c0_i32_0 : i32, i32
  }
  func.func @transform_14(%arg0: i32, %arg1: i32) -> (i32, i32, i32) {
    %c0_i32 = arith.constant 0 : i32
    %c0_i32_0 = arith.constant 0 : i32
    return %arg0, %arg1, %c0_i32 : i32, i32, i32
  }
  func.func @transform_15(%arg0: i32, %arg1: i32) -> (i32, i32, i32) {
    %c0_i32 = arith.constant 0 : i32
    %c0_i32_0 = arith.constant 0 : i32
    return %arg0, %arg1, %c0_i32 : i32, i32, i32
  }
}

</mosaic_0001>

<bundles_post_ra>
// kernel: tpu_custom_call.1
= control target key start
LH: loop header
LB: loop body
LE: loop exit
PB: predicated region body
PF: predicated region fallthrough
CT: control target
= control target key end

     0   :  { %7 = vsyncpa [#allocation3], 0  ;;  %s690_s0 = inlined_call_operand.hbm [shape: f32[16,128], index: 0, kind: input, shape index: {}]   ;;  %s691_s1 = inlined_call_operand.hbm [shape: f32[8,128], index: 1, kind: input, shape index: {}]   ;;  %s692_s2 = inlined_call_operand.hbm [shape: f32[16,128], index: 2, kind: output, shape index: {}]  }
   0x1   :  { %9 = vsyncpa [#allocation3 + $0x1], 0 }
   0x2   :  { %10 = vsyncpa [#allocation6], 0 }
   0x3   :  { %11 = vsyncpa [#allocation4], 0 }
   0x4   :  { %13 = vsyncpa [#allocation4 + $0x1], 0  ;;  %s489_s9 = smov 0   ;;  %s491_s10 = smov 0  }
   0x5   :  { %s493_s11 = smov 0   ;;  %s495_s12 = smov 0  }
   0x6 LB: > { %s510_s13 = sadd.s32 4294967295, %s469_s12   ;;  %s270_s14 = sadd.s32 4294967294, %s469_s12   ;;  %s469_s12 = sphi %s495_s12, %s716_s12   ;;  %s465_s11 = sphi %s493_s11, %s715_s11   ;;  %s461_s10 = sphi %s491_s10, %s714_s10   ;;  %s457_s9 = sphi %s489_s9, %s713_s9  }
   0x7   : > { %p39_p0 = scmp.ne.s32.totalorder %s461_s10, %s457_s9  ;;  %p693_p1 = scmp.eq.s32.totalorder %s510_s13, 0 }
   0x8   : > { %p90_p3 = scmp.eq.s32.totalorder %s270_s14, 1  ;;  %p271_p5 = scmp.ge.s32.totalorder %s469_s12, 1 }
   0x9   : > { %p519_p4 = por %p693_p1, %p39_p0  ;;  %p97_p7 = scmp.lt.s32.totalorder %s469_s12, 3 }
   0xa   : > { %p524_p6 = por %p90_p3, %p39_p0  ;;  %s471_s18 = smov [#allocation5]  }
   0xb   : > { %s696_s15 = scalar_select %p519_p4, 1, 0 }
   0xc   : > { %s697_s16 = scalar_select %p524_p6, 1, 0 }
   0xd   : > { %p529_p8 = pnand %p271_p5, %p97_p7  ;;  %s110_s19 = sshll.u32 %s471_s18, 4  ;;  %s111_s19 = int_to_ptr.vmem [resolvable:$true] %s110_s19 }
   0xe   : > { %s537_s20 = sadd.s32 1, %s469_s12   ;;  %s26_s24 = sadd.s32 1, %s465_s11 }
   0xf   : > { %s698_s17 = scalar_select %p529_p8, 1, 0 }
  0x10   : > { %p292_p10 = pneg %p529_p8  ;;  %s23_s22 = ssub.s32 %s469_s12, %s537_s20 }
  0x11   : > { %p547_p12 = scmp.eq.s32.totalorder %s23_s22, 0  ;;  %s341_s27 = scalar_lea.hbm %s691_s1, 128 }
  0x12   : > { %p541_p11 = pnand %p292_p10, %p693_p1  ;;  %p342_p0 = scmp.ne.s32.totalorder %s691_s1, %s341_s27 }
  0x13   : > { %s700_s23 = scalar_select %p547_p12, 1, 0 }
  0x14   : > { %p343_p3 = pneg %p541_p11  ;;  %p348_p10 = scmp.lt.u32.totalorder %s341_s27, %s691_s1 }
  0x16   : > { %p344_p5 = pnand %p343_p3, %p342_p0 }
  0x18   : > { %p345_p7 = pneg %p344_p5 }
  0x1a   : > { %p350_p9 = pnand %p348_p10, %p345_p7 }
  0x1c   : > { %353 = shalt.err (!%p350_p9)
}
  0x1d   : > { %s354_s4 = scalar_lea.vmem %s111_s19, 128  ;;  %p362_p6 = scmp.lt.s32.totalorder %s111_s19, %s111_s19 }
  0x1e   : > { %p355_p1 = scmp.ne.s32.totalorder %s111_s19, %s354_s4  ;;  %p363_p4 = scmp.lt.s32.totalorder %s354_s4, %s354_s4 }
  0x20   : > { %p357_p2 = pnand %p355_p1, %p343_p3  ;;  %p364_p8 = por %p363_p4, %p362_p6 }
  0x22   : > { %p358_p13 = pneg %p357_p2 }
  0x24   : > { %p365_p12 = pnand %p364_p8, %p358_p13 }
  0x26   : > { %368 = shalt.err (!%p365_p12)
}
  0x27   : > { %295 = dma.hbm_to_vmem [thread:$0]  (!%p541_p11), %s691_s1, 128, %s111_s19, [#allocation6]  }
  0x28   : > { %p701_p1 = scmp.ne.s32.totalorder %s700_s23, 0  ;;  %p34_p2 = scmp.eq.s32.totalorder %s469_s12, 0 }
  0x29   : > { %p702_p4 = scmp.ne.s32.totalorder %s465_s11, %s461_s10  ;;  %p703_p6 = scmp.eq.s32.totalorder %s510_s13, 1 }
  0x2a   : > { %s573_s7 = scalar_select %p701_p1, %s465_s11, %s26_s24  }
  0x2b   : > { %p581_p8 = por %p703_p6, %p702_p4  ;;  %p305_p9 = scmp.lt.s32.totalorder %s469_s12, 2 }
  0x2c   : > { %s121_s14 = sand.u32 1, %s465_s11   ;;  %p705_p12 = pmov %p702_p4 }
  0x2d   : > { %s274_s18 = sshll.u32 %s121_s14, 3  ;;  %s275_s21 = sshll.u32 %s469_s12, 7 }
  0x2e   : > { %p35_p13 = por %p34_p2, %p705_p12  ;;  %s594_s19 = scalar_lea.hbm %s690_s0, %s275_s21 }
  0x2f   : > { %s125_s23 = scalar_lea.vmem [#allocation2], %s274_s18  ;;  %s122_s27 = scalar_lea.sflag [#allocation3], %s121_s14 }
  0x30   : > { %s132_s24 = sshll.u32 %s125_s23, 4  ;;  %p596_p11 = pnand %p305_p9, %p35_p13  ;;  %s600_s24 = int_to_ptr.vmem [resolvable:$true] %s132_s24 }
  0x31   : > { %s369_s28 = scalar_lea.hbm %s594_s19, 128  ;;  %s374_s3 = scalar_lea.hbm %s690_s0, 256 }
  0x32   : > { %p370_p0 = scmp.ne.s32.totalorder %s594_s19, %s369_s28  ;;  %p371_p3 = pneg %p596_p11 }
  0x33   : > { %p375_p10 = scmp.lt.u32.totalorder %s594_s19, %s690_s0  ;;  %p376_p1 = scmp.lt.u32.totalorder %s374_s3, %s369_s28 }
  0x34   : > { %p372_p5 = pnand %p371_p3, %p370_p0  ;;  %p378_p4 = scmp.lt.u32.totalorder %s369_s28, %s594_s19 }
  0x35   : > { %p377_p2 = por %p376_p1, %p375_p10 }
  0x36   : > { %p373_p7 = pneg %p372_p5 }
  0x37   : > { %p379_p6 = por %p378_p4, %p377_p2 }
  0x39   : > { %p380_p9 = pnand %p379_p6, %p373_p7 }
  0x3b   : > { %383 = shalt.err (!%p380_p9)
}
  0x3c   : > { %s384_s6 = scalar_lea.vmem %s600_s24, 128  ;;  %s472_s14 = smov [#allocation2]  }
  0x3d   : > { %p385_p12 = scmp.ne.s32.totalorder %s600_s24, %s384_s6  ;;  %s389_s18 = sshll.u32 %s472_s14, 4  ;;  %s390_s18 = int_to_ptr.vmem [resolvable:$false] %s389_s18 }
  0x3e   : > { %s391_s21 = scalar_lea.vmem %s390_s18, 256  ;;  %p392_p5 = scmp.lt.s32.totalorder %s600_s24, %s390_s18 }
  0x3f   : > { %p387_p13 = pnand %p385_p12, %p371_p3  ;;  %p393_p10 = scmp.lt.s32.totalorder %s391_s21, %s384_s6 }
  0x41   : > { %p388_p0 = pneg %p387_p13  ;;  %p394_p1 = por %p393_p10, %p392_p5 }
  0x43   : > { %p395_p2 = pnand %p394_p1, %p388_p0 }
  0x45   : > { %398 = shalt.err (!%p395_p2)
}
  0x46   : > { %299 = dma.hbm_to_vmem [thread:$0]  (!%p596_p11), %s594_s19, 128, %s600_s24, %s122_s27  }
  0x47   : > { %p707_p7 = scmp.ne.s32.totalorder %s698_s17, 0 }
  0x48   : > { %s630_s22 = sand.u32 (!%p707_p7), 1, %s461_s10   ;;  %p708_p3 = scmp.ne.s32.totalorder (!%p707_p7), %s696_s15, 0 }
  0x49   : > { %141 = sbr.rel (%p707_p7) target bundleno = 109 (0x6d), region = 28  ;;  %s277_s25 = sshll.u32 (!%p707_p7), %s630_s22, 3 }
  0x4a   : > { %s144_s23 = scalar_lea.sflag (!%p707_p7), [#allocation3], %s630_s22  ;;  %s147_s28 = scalar_lea.vmem (!%p707_p7), [#allocation2], %s277_s25 }
  0x50   : > { %444 = dma.done.wait (%p708_p3), %s144_s23, 128  }
  0x51   : > { %446 = vsyncadd (%p708_p3), %s144_s23, 4294967168  ;;  %p709_p4 = scmp.eq.s32.totalorder %s510_s13, 0 }
  0x53   : > { %448 = dma.done.wait (%p709_p4), [#allocation6], 128   ;;  %p710_p11 = pmov %p709_p4 }
  0x54   : > { %s171_s17 = scalar_lea.vmem [#allocation7], %s277_s25  ;;  %s281_s24 = sshll.u32 %s510_s13, 7  ;;  %v172_v0 = vld [vmem:[%s147_s28] sm:$0xff]  ;;  %v173_v1 = vld [vmem:[#allocation5] sm:$0xff] }
  0x55   : > { %450 = vsyncadd (%p710_p11), [#allocation6], 4294967168  ;;  %s190_s19 = sshll.u32 %s171_s17, 4  ;;  %v174_v2 = vadd.f32 %v173_v1, %v172_v0  ;;  %s648_s27 = scalar_lea.hbm %s692_s2, %s281_s24  ;;  %s643_s19 = int_to_ptr.vmem [resolvable:$true] %s190_s19 }
  0x56   : > { %s177_s29 = scalar_lea.sflag [#allocation4], %s630_s22  ;;  %s399_s30 = scalar_lea.vmem %s643_s19, 128 }
  0x57   : > { %175 = vst [vmem:[%s171_s17] sm:$0xff] %v174_v2  ;;  %p400_p6 = scmp.ne.s32.totalorder %s643_s19, %s399_s30  ;;  %s473_s13 = smov [#allocation7]  }
  0x58   : > { %s403_s3 = sshll.u32 %s473_s13, 4  ;;  %s404_s3 = int_to_ptr.vmem [resolvable:$false] %s403_s3 }
  0x59   : > { %p401_p9 = pnand %p400_p6, %p581_p8  ;;  %s405_s4 = scalar_lea.vmem %s404_s3, 256 }
  0x5a   : > { %p406_p13 = scmp.lt.s32.totalorder %s643_s19, %s404_s3  ;;  %p407_p0 = scmp.lt.s32.totalorder %s405_s4, %s399_s30 }
  0x5b   : > { %p402_p12 = pneg %p401_p9 }
  0x5c   : > { %p408_p5 = por %p407_p0, %p406_p13 }
  0x5e   : > { %p409_p10 = pnand %p408_p5, %p402_p12 }
  0x60   : > { %412 = shalt.err (!%p409_p10)
}
  0x61   : > { %s413_s5 = scalar_lea.hbm %s648_s27, 128  ;;  %s417_s18 = scalar_lea.hbm %s692_s2, 256 }
  0x62   : > { %p414_p1 = scmp.ne.s32.totalorder %s648_s27, %s413_s5  ;;  %p418_p3 = scmp.lt.u32.totalorder %s648_s27, %s692_s2 }
  0x63   : > { %p419_p4 = scmp.lt.u32.totalorder %s417_s18, %s413_s5  ;;  %p421_p6 = scmp.lt.u32.totalorder %s413_s5, %s648_s27 }
  0x64   : > { %p415_p2 = pnand %p414_p1, %p581_p8 }
  0x65   : > { %p420_p11 = por %p419_p4, %p418_p3 }
  0x66   : > { %p416_p7 = pneg %p415_p2 }
  0x67   : > { %p422_p9 = por %p421_p6, %p420_p11 }
  0x69   : > { %p423_p12 = pnand %p422_p9, %p416_p7 }
  0x6b   : > { %426 = shalt.err (!%p423_p12)
}
  0x6c   : > { %290 = dma.vmem_to_hbm [thread:$0]  (%p581_p8), %s643_s19, 128, %s648_s27, %s177_s29  }
  0x6d PF: > { %s202_s25 = sand.u32 1, %s457_s9   ;;  %p711_p13 = scmp.ne.s32.totalorder %s697_s16, 0 }
  0x6e   : > { %p712_p0 = scmp.ge.s32.totalorder %s469_s12, 2  ;;  %s203_s23 = scalar_lea.sflag [#allocation4], %s202_s25 }
  0x70   : > { %p301_p5 = pnand %p712_p0, %p711_p13 }
  0x72   : > { %452 = dma.done.wait (!%p301_p5), %s203_s23, 128  }
  0x73   : > { %454 = vsyncadd (!%p301_p5), %s203_s23, 4294967168  ;;  %p16_p10 = scmp.ge.s32.totalorder %s537_s20, 4   ;;  %s713_s9 = smov %s461_s10 }
  0x74   : > { %s714_s10 = smov %s465_s11  ;;  %s715_s11 = smov %s573_s7 }
  0x75   : > { %s716_s12 = smov %s537_s20  ;;  %18 = sbr.rel (!%p16_p10) target bundleno = 6 (0x6), region = 77 }
  0x7c   :  { %208 = vsyncpa [#allocation3], 1 }
  0x7d   :  { %210 = vsyncpa [#allocation3 + $0x1], 1 }
  0x7e   :  { %211 = vsyncpa [#allocation6], 1 }
  0x7f   :  { %212 = vsyncpa [#allocation4], 1 }
  0x80   :  { %214 = vsyncpa [#allocation4 + $0x1], 1 }

// kernel: tpu_custom_call.1
= control target key start
LH: loop header
LB: loop body
LE: loop exit
PB: predicated region body
PF: predicated region fallthrough
CT: control target
= control target key end

     0   :  { %s3822_s0 = inlined_call_operand.hbm [shape: f32[2,8,24], index: 0, kind: input, shape index: {}]   ;;  %s3823_s1 = inlined_call_operand.hbm [shape: f32[2,16,32], index: 1, kind: input, shape index: {}]   ;;  %s3824_s2 = inlined_call_operand.hbm [shape: bf16[24,32], index: 2, kind: input, shape index: {}]   ;;  %s3825_s3 = inlined_call_operand.hbm [shape: f32[1,32], index: 3, kind: input, shape index: {}]   ;;  %s3826_s4 = inlined_call_operand.hbm [shape: bf16[32,32], index: 4, kind: input, shape index: {}]   ;;  %s3827_s5 = inlined_call_operand.hbm [shape: f32[1,32], index: 5, kind: input, shape index: {}]   ;;  %s3828_s6 = inlined_call_operand.hbm [shape: bf16[32,32], index: 6, kind: input, shape index: {}]   ;;  %s3829_s7 = inlined_call_operand.hbm [shape: f32[1,32], index: 7, kind: input, shape index: {}]   ;;  %s3830_s8 = inlined_call_operand.hbm [shape: bf16[32,32], index: 8, kind: input, shape index: {}]   ;;  %s3831_s9 = inlined_call_operand.hbm [shape: f32[1,32], index: 9, kind: input, shape index: {}]   ;;  %s3832_s10 = inlined_call_operand.hbm [shape: bf16[32,32], index: 10, kind: input, shape index: {}]   ;;  %s3833_s11 = inlined_call_operand.hbm [shape: f32[1,32], index: 11, kind: input, shape index: {}]   ;;  %s3834_s12 = inlined_call_operand.hbm [shape: bf16[24,32], index: 12, kind: input, shape index: {}]   ;;  %s3835_s13 = inlined_call_operand.hbm [shape: f32[1,32], index: 13, kind: input, shape index: {}]   ;;  %s3836_s14 = inlined_call_operand.hbm [shape: f32[2,8,32], index: 14, kind: output, shape index: {0}]   ;;  %s3837_s15 = inlined_call_operand.hbm [shape: f32[2,8,16], index: 15, kind: output, shape index: {1}]  }
   0x1   :  { %3853 = sst [smem:[#allocation46_spill]] %s3822_s0 }
   0x2   :  { %3854 = sst [smem:[#allocation47_spill]] %s3823_s1 }
   0x3   :  { %3855 = sst [smem:[#allocation48_spill]] %s3824_s2 }
   0x4   :  { %3856 = sst [smem:[#allocation49_spill]] %s3825_s3 }
   0x5   :  { %3857 = sst [smem:[#allocation50_spill]] %s3826_s4 }
   0x6   :  { %3858 = sst [smem:[#allocation51_spill]] %s3827_s5 }
   0x7   :  { %3859 = sst [smem:[#allocation52_spill]] %s3828_s6 }
   0x8   :  { %3860 = sst [smem:[#allocation53_spill]] %s3829_s7 }
   0x9   :  { %3861 = sst [smem:[#allocation54_spill]] %s3836_s14 }
   0xa   :  { %3862 = sst [smem:[#allocation55_spill]] %s3837_s15 }
   0xb   :  { %21 = vsyncpa [#allocation5], 0 }
   0xc   :  { %23 = vsyncpa [#allocation5 + $0x1], 0 }
   0xd   :  { %24 = vsyncpa [#allocation8], 0 }
   0xe   :  { %26 = vsyncpa [#allocation8 + $0x1], 0 }
   0xf   :  { %27 = vsyncpa [#allocation11], 0 }
  0x10   :  { %28 = vsyncpa [#allocation14], 0 }
  0x11   :  { %29 = vsyncpa [#allocation17], 0 }
  0x12   :  { %30 = vsyncpa [#allocation20], 0 }
  0x13   :  { %31 = vsyncpa [#allocation23], 0 }
  0x14   :  { %32 = vsyncpa [#allocation26], 0 }
  0x15   :  { %33 = vsyncpa [#allocation6], 0 }
  0x16   :  { %35 = vsyncpa [#allocation6 + $0x1], 0 }
  0x17   :  { %36 = vsyncpa [#allocation29], 0 }
  0x18   :  { %38 = vsyncpa [#allocation29 + $0x1], 0  ;;  %s3131_s18 = smov 0   ;;  %s3133_s19 = smov 0  }
  0x19   :  { %s3135_s20 = smov 0   ;;  %s3137_s21 = smov 0  }
  0x1a   :  { %s3139_s22 = smov 0   ;;  %s3141_s23 = smov 0  }
  0x1b LB: > { %3863 = sst [smem:[#allocation41_spill]] %s3004_s18  ;;  %s3162_s24 = sadd.s32 4294967295, %s3024_s23   ;;  %s3024_s23 = sphi %s3141_s23, %s44_s23   ;;  %s3020_s22 = sphi %s3139_s22, %s3920_s22   ;;  %s3016_s21 = sphi %s3137_s21, %s3919_s21   ;;  %s3012_s20 = sphi %s3135_s20, %s3918_s20   ;;  %s3008_s19 = sphi %s3133_s19, %s3917_s19   ;;  %s3004_s18 = sphi %s3131_s18, %s3915_s18  }
  0x1c   : > { %3864 = sst [smem:[#allocation42_spill]] %s3008_s19  ;;  %p2022_p0 = scmp.ge.s32.totalorder %s3024_s23, 1 }
  0x1d   : > { %3865 = sst [smem:[#allocation43_spill]] %s3016_s21  ;;  %p3848_p1 = scmp.eq.s32.totalorder %s3162_s24, 0 }
  0x1e   : > { %3866 = sst [smem:[#allocation44_spill]] %s3162_s24  ;;  %p423_p2 = scmp.lt.s32.totalorder %s3024_s23, 3 }
  0x1f   : > { %s3026_s26 = smov [#allocation9]   ;;  %s3027_s29 = smov [#allocation10]  }
  0x20   : > { %p3167_p3 = pnand %p2022_p0, %p423_p2  ;;  %s435_s27 = sshll.u32 %s3026_s26, 4  ;;  %s3171_s27 = int_to_ptr.vmem [resolvable:$true] %s435_s27 }
  0x21   : > { %s449_s30 = sshll.u32 %s3027_s29, 4  ;;  %s3028_s16 = smov [#allocation13]   ;;  %s3182_s30 = int_to_ptr.vmem [resolvable:$true] %s449_s30 }
  0x22   : > { %s3867_s25 = scalar_select %p3167_p3, 1, 0 }
  0x23   : > { %p2306_p4 = pneg %p3167_p3  ;;  %s3184_s17 = sshll.u32 %s3028_s16, 4  ;;  %s474_s17 = int_to_ptr.vmem [resolvable:$true] %s3184_s17 }
  0x24   : > { %3868 = sst [smem:[#allocation45_spill]] %s3867_s25  ;;  %s3870_s2 = sld [smem:[#allocation48_spill]] }
  0x25   : > { %p3178_p6 = pnand %p2306_p4, %p3848_p1 }
  0x27   : > { %p3194_p8 = pneg %p3178_p6 }
  0x2a   : > { %s2482_s15 = scalar_lea.hbm %s3870_s2, 192 }
  0x2b   : > { %p2483_p7 = scmp.ne.s32.totalorder %s3870_s2, %s2482_s15  ;;  %p2489_p11 = scmp.lt.u32.totalorder %s2482_s15, %s3870_s2 }
  0x2d   : > { %p2485_p9 = pnand %p3194_p8, %p2483_p7 }
  0x2f   : > { %p2486_p10 = pneg %p2485_p9 }
  0x31   : > { %p2491_p12 = pnand %p2489_p11, %p2486_p10 }
  0x33   : > { %2494 = shalt.err (!%p2491_p12)
}
  0x34   : > { %s2495_s14 = scalar_lea.vmem %s3171_s27, 192  ;;  %p2503_p4 = scmp.lt.s32.totalorder %s3171_s27, %s3171_s27 }
  0x35   : > { %p2496_p13 = scmp.ne.s32.totalorder %s3171_s27, %s2495_s14  ;;  %p2504_p5 = scmp.lt.s32.totalorder %s2495_s14, %s2495_s14 }
  0x37   : > { %p2498_p0 = pnand %p2496_p13, %p3194_p8  ;;  %p2505_p7 = por %p2504_p5, %p2503_p4 }
  0x39   : > { %p2499_p2 = pneg %p2498_p0 }
  0x3b   : > { %p2506_p9 = pnand %p2505_p7, %p2499_p2 }
  0x3d   : > { %2509 = shalt.err (!%p2506_p9)
}
  0x3e   : > { %s3850_s21 = smov 64   ;;  %s3030_s15 = smov 4  }
  0x3f   : > { %2309 = dma.hbm_to_vmem [thread:$0]  (!%p3178_p6), %s3870_s2, 192, %s3171_s27, [#allocation8], %s3850_s21, %s3850_s21, %s3030_s15  }
  0x40   : > { %s3872_s3 = sld [smem:[#allocation49_spill]] }
  0x46   : > { %s2510_s14 = scalar_lea.hbm %s3872_s3, 16 }
  0x47   : > { %p2511_p5 = scmp.ne.s32.totalorder %s3872_s3, %s2510_s14  ;;  %p2517_p12 = scmp.lt.u32.totalorder %s2510_s14, %s3872_s3 }
  0x49   : > { %p2513_p10 = pnand %p2511_p5, %p3194_p8 }
  0x4b   : > { %p2514_p11 = pneg %p2513_p10 }
  0x4d   : > { %p2519_p13 = pnand %p2517_p12, %p2514_p11 }
  0x4f   : > { %2522 = shalt.err (!%p2519_p13)
}
  0x50   : > { %s2523_s27 = scalar_lea.vmem %s3182_s30, 16  ;;  %s2530_s0 = scalar_lea.vmem %s3182_s30, 32 }
  0x51   : > { %p2524_p0 = scmp.ne.s32.totalorder %s3182_s30, %s2523_s27  ;;  %p2531_p7 = scmp.lt.s32.totalorder %s3182_s30, %s3182_s30 }
  0x52   : > { %p2532_p9 = scmp.lt.s32.totalorder %s2530_s0, %s2523_s27 }
  0x53   : > { %p2526_p2 = pnand %p2524_p0, %p3194_p8 }
  0x54   : > { %p2533_p5 = por %p2532_p9, %p2531_p7 }
  0x55   : > { %p2527_p4 = pneg %p2526_p2 }
  0x57   : > { %p2534_p10 = pnand %p2533_p5, %p2527_p4 }
  0x59   : > { %2537 = shalt.err (!%p2534_p10)
}
  0x5a   : > { %2312 = dma.hbm_to_vmem [thread:$0]  (!%p3178_p6), %s3872_s3, 16, %s3182_s30, [#allocation11]  }
  0x5b   : > { %s3873_s5 = sld [smem:[#allocation51_spill]] }
  0x61   : > { %s2538_s26 = scalar_lea.hbm %s3873_s5, 16 }
  0x62   : > { %p2539_p11 = scmp.ne.s32.totalorder %s3873_s5, %s2538_s26  ;;  %p2545_p0 = scmp.lt.u32.totalorder %s2538_s26, %s3873_s5 }
  0x64   : > { %p2541_p12 = pnand %p2539_p11, %p3194_p8 }
  0x66   : > { %p2542_p13 = pneg %p2541_p12 }
  0x68   : > { %p2547_p2 = pnand %p2545_p0, %p2542_p13 }
  0x6a   : > { %2550 = shalt.err (!%p2547_p2)
}
  0x6b   : > { %s2551_s0 = scalar_lea.vmem %s474_s17, 16  ;;  %s2558_s30 = scalar_lea.vmem %s474_s17, 32 }
  0x6c   : > { %p2552_p4 = scmp.ne.s32.totalorder %s474_s17, %s2551_s0  ;;  %p2559_p5 = scmp.lt.s32.totalorder %s474_s17, %s474_s17 }
  0x6d   : > { %p2560_p10 = scmp.lt.s32.totalorder %s2558_s30, %s2551_s0 }
  0x6e   : > { %p2554_p7 = pnand %p2552_p4, %p3194_p8 }
  0x6f   : > { %p2561_p1 = por %p2560_p10, %p2559_p5 }
  0x70   : > { %p2555_p9 = pneg %p2554_p7 }
  0x72   : > { %p2562_p3 = pnand %p2561_p1, %p2555_p9 }
  0x74   : > { %2565 = shalt.err (!%p2562_p3)
}
  0x75   : > { %2318 = dma.hbm_to_vmem [thread:$0]  (!%p3178_p6), %s3873_s5, 16, %s474_s17, [#allocation14]  }
  0x76   : > { %s3031_s24 = smov [#allocation16]   ;;  %s3032_s26 = smov [#allocation19]  }
  0x77   : > { %s497_s25 = sshll.u32 %s3031_s24, 4  ;;  %s521_s29 = sshll.u32 %s3032_s26, 4  ;;  %s498_s25 = int_to_ptr.vmem [resolvable:$true] %s497_s25  ;;  %s522_s29 = int_to_ptr.vmem [resolvable:$true] %s521_s29 }
  0x78   : > { %s3874_s7 = sld [smem:[#allocation53_spill]] }
  0x7e   : > { %s2566_s27 = scalar_lea.hbm %s3874_s7, 16 }
  0x7f   : > { %p2567_p1 = scmp.ne.s32.totalorder %s3874_s7, %s2566_s27  ;;  %p2573_p12 = scmp.lt.u32.totalorder %s2566_s27, %s3874_s7 }
  0x81   : > { %p2569_p3 = pnand %p2567_p1, %p3194_p8 }
  0x83   : > { %p2570_p11 = pneg %p2569_p3 }
  0x85   : > { %p2575_p13 = pnand %p2573_p12, %p2570_p11 }
  0x87   : > { %2578 = shalt.err (!%p2575_p13)
}
  0x88   : > { %s2579_s17 = scalar_lea.vmem %s498_s25, 16  ;;  %s2586_s19 = scalar_lea.vmem %s498_s25, 32 }
  0x89   : > { %p2580_p0 = scmp.ne.s32.totalorder %s498_s25, %s2579_s17  ;;  %p2587_p7 = scmp.lt.s32.totalorder %s498_s25, %s498_s25 }
  0x8a   : > { %p2588_p9 = scmp.lt.s32.totalorder %s2586_s19, %s2579_s17 }
  0x8b   : > { %p2582_p2 = pnand %p2580_p0, %p3194_p8 }
  0x8c   : > { %p2589_p5 = por %p2588_p9, %p2587_p7 }
  0x8d   : > { %p2583_p4 = pneg %p2582_p2 }
  0x8f   : > { %p2590_p10 = pnand %p2589_p5, %p2583_p4 }
  0x91   : > { %2593 = shalt.err (!%p2590_p10)
}
  0x92   : > { %2324 = dma.hbm_to_vmem [thread:$0]  (!%p3178_p6), %s3874_s7, 16, %s498_s25, [#allocation17]  }
  0x93   : > { %s2594_s14 = scalar_lea.hbm %s3831_s9, 16 }
  0x94   : > { %p2595_p1 = scmp.ne.s32.totalorder %s3831_s9, %s2594_s14  ;;  %p2601_p12 = scmp.lt.u32.totalorder %s2594_s14, %s3831_s9 }
  0x96   : > { %p2597_p3 = pnand %p2595_p1, %p3194_p8 }
  0x98   : > { %p2598_p11 = pneg %p2597_p3 }
  0x9a   : > { %p2603_p13 = pnand %p2601_p12, %p2598_p11 }
  0x9c   : > { %2606 = shalt.err (!%p2603_p13)
}
  0x9d   : > { %s2607_s17 = scalar_lea.vmem %s522_s29, 16  ;;  %s2614_s25 = scalar_lea.vmem %s522_s29, 32 }
  0x9e   : > { %p2608_p0 = scmp.ne.s32.totalorder %s522_s29, %s2607_s17  ;;  %p2615_p7 = scmp.lt.s32.totalorder %s522_s29, %s522_s29 }
  0x9f   : > { %p2616_p9 = scmp.lt.s32.totalorder %s2614_s25, %s2607_s17 }
  0xa0   : > { %p2610_p2 = pnand %p2608_p0, %p3194_p8 }
  0xa1   : > { %p2617_p5 = por %p2616_p9, %p2615_p7 }
  0xa2   : > { %p2611_p4 = pneg %p2610_p2 }
  0xa4   : > { %p2618_p10 = pnand %p2617_p5, %p2611_p4 }
  0xa6   : > { %2621 = shalt.err (!%p2618_p10)
}
  0xa7   : > { %2330 = dma.hbm_to_vmem [thread:$0]  (!%p3178_p6), %s3831_s9, 16, %s522_s29, [#allocation20]  }
  0xa8   : > { %s3033_s26 = smov [#allocation22]   ;;  %s3034_s16 = smov [#allocation12]  }
  0xa9   : > { %s545_s21 = sshll.u32 %s3033_s26, 4  ;;  %s459_s14 = sshll.u32 %s3034_s16, 4  ;;  %s546_s21 = int_to_ptr.vmem [resolvable:$true] %s545_s21  ;;  %s460_s14 = int_to_ptr.vmem [resolvable:$true] %s459_s14 }
  0xaa   : > { %s2622_s30 = scalar_lea.hbm %s3833_s11, 16 }
  0xab   : > { %p2623_p1 = scmp.ne.s32.totalorder %s3833_s11, %s2622_s30  ;;  %p2629_p12 = scmp.lt.u32.totalorder %s2622_s30, %s3833_s11 }
  0xad   : > { %p2625_p3 = pnand %p2623_p1, %p3194_p8 }
  0xaf   : > { %p2626_p11 = pneg %p2625_p3 }
  0xb1   : > { %p2631_p13 = pnand %p2629_p12, %p2626_p11 }
  0xb3   : > { %2634 = shalt.err (!%p2631_p13)
}
  0xb4   : > { %s2635_s29 = scalar_lea.vmem %s546_s21, 16  ;;  %s2642_s24 = scalar_lea.vmem %s546_s21, 32 }
  0xb5   : > { %p2636_p0 = scmp.ne.s32.totalorder %s546_s21, %s2635_s29  ;;  %p2643_p7 = scmp.lt.s32.totalorder %s546_s21, %s546_s21 }
  0xb6   : > { %p2644_p9 = scmp.lt.s32.totalorder %s2642_s24, %s2635_s29 }
  0xb7   : > { %p2638_p2 = pnand %p2636_p0, %p3194_p8 }
  0xb8   : > { %p2645_p5 = por %p2644_p9, %p2643_p7 }
  0xb9   : > { %p2639_p4 = pneg %p2638_p2 }
  0xbb   : > { %p2646_p10 = pnand %p2645_p5, %p2639_p4 }
  0xbd   : > { %2649 = shalt.err (!%p2646_p10)
}
  0xbe   : > { %2336 = dma.hbm_to_vmem [thread:$0]  (!%p3178_p6), %s3833_s11, 16, %s546_s21, [#allocation23]  }
  0xbf   : > { %s3875_s4 = sld [smem:[#allocation50_spill]] }
  0xc5   : > { %s2650_s30 = scalar_lea.hbm %s3875_s4, 256 }
  0xc6   : > { %p2651_p1 = scmp.ne.s32.totalorder %s3875_s4, %s2650_s30  ;;  %p2657_p12 = scmp.lt.u32.totalorder %s2650_s30, %s3875_s4 }
  0xc8   : > { %p2653_p3 = pnand %p2651_p1, %p3194_p8 }
  0xca   : > { %p2654_p11 = pneg %p2653_p3 }
  0xcc   : > { %p2659_p13 = pnand %p2657_p12, %p2654_p11 }
  0xce   : > { %2662 = shalt.err (!%p2659_p13)
}
  0xcf   : > { %s2663_s29 = scalar_lea.vmem %s460_s14, 256  ;;  %p2671_p7 = scmp.lt.s32.totalorder %s460_s14, %s460_s14 }
  0xd0   : > { %p2664_p0 = scmp.ne.s32.totalorder %s460_s14, %s2663_s29  ;;  %p2672_p9 = scmp.lt.s32.totalorder %s2663_s29, %s2663_s29 }
  0xd2   : > { %p2666_p2 = pnand %p2664_p0, %p3194_p8  ;;  %p2673_p5 = por %p2672_p9, %p2671_p7 }
  0xd4   : > { %p2667_p4 = pneg %p2666_p2 }
  0xd6   : > { %p2674_p10 = pnand %p2673_p5, %p2667_p4 }
  0xd8   : > { %2677 = shalt.err (!%p2674_p10)
}
  0xd9   : > { %s3876_s21 = smov 64   ;;  %s3035_s16 = smov [#allocation15]  }
  0xda   : > { %2315 = dma.hbm_to_vmem [thread:$0]  (!%p3178_p6), %s3875_s4, 256, %s460_s14, [#allocation11], %s3876_s21, %s3876_s21, %s3030_s15  }
  0xdb   : > { %s483_s27 = sshll.u32 %s3035_s16, 4  ;;  %s3036_s0 = smov [#allocation18]   ;;  %s484_s27 = int_to_ptr.vmem [resolvable:$true] %s483_s27 }
  0xdc   : > { %s507_s30 = sshll.u32 %s3036_s0, 4  ;;  %s3877_s6 = sld [smem:[#allocation52_spill]]  ;;  %s508_s30 = int_to_ptr.vmem [resolvable:$true] %s507_s30 }
  0xe2   : > { %s2678_s25 = scalar_lea.hbm %s3877_s6, 256 }
  0xe3   : > { %p2679_p1 = scmp.ne.s32.totalorder %s3877_s6, %s2678_s25  ;;  %p2685_p12 = scmp.lt.u32.totalorder %s2678_s25, %s3877_s6 }
  0xe5   : > { %p2681_p3 = pnand %p2679_p1, %p3194_p8 }
  0xe7   : > { %p2682_p11 = pneg %p2681_p3 }
  0xe9   : > { %p2687_p13 = pnand %p2685_p12, %p2682_p11 }
  0xeb   : > { %2690 = shalt.err (!%p2687_p13)
}
  0xec   : > { %s2691_s14 = scalar_lea.vmem %s484_s27, 256  ;;  %p2699_p7 = scmp.lt.s32.totalorder %s484_s27, %s484_s27 }
  0xed   : > { %p2692_p0 = scmp.ne.s32.totalorder %s484_s27, %s2691_s14  ;;  %p2700_p9 = scmp.lt.s32.totalorder %s2691_s14, %s2691_s14 }
  0xef   : > { %p2694_p2 = pnand %p2692_p0, %p3194_p8  ;;  %p2701_p5 = por %p2700_p9, %p2699_p7 }
  0xf1   : > { %p2695_p4 = pneg %p2694_p2 }
  0xf3   : > { %p2702_p10 = pnand %p2701_p5, %p2695_p4 }
  0xf5   : > { %2705 = shalt.err (!%p2702_p10)
}
  0xf6   : > { %2321 = dma.hbm_to_vmem [thread:$0]  (!%p3178_p6), %s3877_s6, 256, %s484_s27, [#allocation14], %s3876_s21, %s3876_s21, %s3030_s15  }
  0xf7   : > { %s2706_s18 = scalar_lea.hbm %s3830_s8, 256 }
  0xf8   : > { %p2707_p1 = scmp.ne.s32.totalorder %s3830_s8, %s2706_s18  ;;  %p2713_p12 = scmp.lt.u32.totalorder %s2706_s18, %s3830_s8 }
  0xfa   : > { %p2709_p3 = pnand %p2707_p1, %p3194_p8 }
  0xfc   : > { %p2710_p11 = pneg %p2709_p3 }
  0xfe   : > { %p2715_p13 = pnand %p2713_p12, %p2710_p11 }
 0x100   : > { %2718 = shalt.err (!%p2715_p13)
}
 0x101   : > { %s2719_s24 = scalar_lea.vmem %s508_s30, 256  ;;  %p2727_p7 = scmp.lt.s32.totalorder %s508_s30, %s508_s30 }
 0x102   : > { %p2720_p0 = scmp.ne.s32.totalorder %s508_s30, %s2719_s24  ;;  %p2728_p9 = scmp.lt.s32.totalorder %s2719_s24, %s2719_s24 }
 0x104   : > { %p2722_p2 = pnand %p2720_p0, %p3194_p8  ;;  %p2729_p5 = por %p2728_p9, %p2727_p7 }
 0x106   : > { %p2723_p4 = pneg %p2722_p2 }
 0x108   : > { %p2730_p10 = pnand %p2729_p5, %p2723_p4 }
 0x10a   : > { %2733 = shalt.err (!%p2730_p10)
}
 0x10b   : > { %2327 = dma.hbm_to_vmem [thread:$0]  (!%p3178_p6), %s3830_s8, 256, %s508_s30, [#allocation17], %s3876_s21, %s3876_s21, %s3030_s15  }
 0x10c   : > { %s3037_s2 = smov [#allocation21]   ;;  %s3038_s16 = smov [#allocation24]  }
 0x10d   : > { %s531_s26 = sshll.u32 %s3037_s2, 4  ;;  %s555_s0 = sshll.u32 %s3038_s16, 4  ;;  %s532_s26 = int_to_ptr.vmem [resolvable:$true] %s531_s26  ;;  %s556_s0 = int_to_ptr.vmem [resolvable:$true] %s555_s0 }
 0x10e   : > { %s2734_s25 = scalar_lea.hbm %s3832_s10, 256 }
 0x10f   : > { %p2735_p1 = scmp.ne.s32.totalorder %s3832_s10, %s2734_s25  ;;  %p2741_p12 = scmp.lt.u32.totalorder %s2734_s25, %s3832_s10 }
 0x111   : > { %p2737_p3 = pnand %p2735_p1, %p3194_p8 }
 0x113   : > { %p2738_p11 = pneg %p2737_p3 }
 0x115   : > { %p2743_p13 = pnand %p2741_p12, %p2738_p11 }
 0x117   : > { %2746 = shalt.err (!%p2743_p13)
}
 0x118   : > { %s2747_s30 = scalar_lea.vmem %s532_s26, 256  ;;  %p2755_p7 = scmp.lt.s32.totalorder %s532_s26, %s532_s26 }
 0x119   : > { %p2748_p0 = scmp.ne.s32.totalorder %s532_s26, %s2747_s30  ;;  %p2756_p9 = scmp.lt.s32.totalorder %s2747_s30, %s2747_s30 }
 0x11b   : > { %p2750_p2 = pnand %p2748_p0, %p3194_p8  ;;  %p2757_p5 = por %p2756_p9, %p2755_p7 }
 0x11d   : > { %p2751_p4 = pneg %p2750_p2 }
 0x11f   : > { %p2758_p10 = pnand %p2757_p5, %p2751_p4 }
 0x121   : > { %2761 = shalt.err (!%p2758_p10)
}
 0x122   : > { %2333 = dma.hbm_to_vmem [thread:$0]  (!%p3178_p6), %s3832_s10, 256, %s532_s26, [#allocation20], %s3876_s21, %s3876_s21, %s3030_s15  }
 0x123   : > { %s2762_s17 = scalar_lea.hbm %s3834_s12, 192 }
 0x124   : > { %p2763_p1 = scmp.ne.s32.totalorder %s3834_s12, %s2762_s17  ;;  %p2769_p12 = scmp.lt.u32.totalorder %s2762_s17, %s3834_s12 }
 0x126   : > { %p2765_p3 = pnand %p2763_p1, %p3194_p8 }
 0x128   : > { %p2766_p11 = pneg %p2765_p3 }
 0x12a   : > { %p2771_p13 = pnand %p2769_p12, %p2766_p11 }
 0x12c   : > { %2774 = shalt.err (!%p2771_p13)
}
 0x12d   : > { %s2775_s27 = scalar_lea.vmem %s556_s0, 192  ;;  %p2783_p7 = scmp.lt.s32.totalorder %s556_s0, %s556_s0 }
 0x12e   : > { %p2776_p0 = scmp.ne.s32.totalorder %s556_s0, %s2775_s27  ;;  %p2784_p9 = scmp.lt.s32.totalorder %s2775_s27, %s2775_s27 }
 0x130   : > { %p2778_p2 = pnand %p2776_p0, %p3194_p8  ;;  %p2785_p5 = por %p2784_p9, %p2783_p7 }
 0x132   : > { %p2779_p4 = pneg %p2778_p2 }
 0x134   : > { %p2786_p10 = pnand %p2785_p5, %p2779_p4 }
 0x136   : > { %2789 = shalt.err (!%p2786_p10)
}
 0x137   : > { %2339 = dma.hbm_to_vmem [thread:$0]  (!%p3178_p6), %s3834_s12, 192, %s556_s0, [#allocation23], %s3876_s21, %s3876_s21, %s3030_s15  }
 0x138   : > { %s3039_s14 = smov [#allocation25]   ;;  %s2790_s17 = scalar_lea.hbm %s3835_s13, 16 }
 0x139   : > { %s569_s2 = sshll.u32 %s3039_s14, 4  ;;  %p2791_p1 = scmp.ne.s32.totalorder %s3835_s13, %s2790_s17  ;;  %s570_s2 = int_to_ptr.vmem [resolvable:$true] %s569_s2 }
 0x13a   : > { %p2797_p12 = scmp.lt.u32.totalorder %s2790_s17, %s3835_s13 }
 0x13b   : > { %p2793_p3 = pnand %p2791_p1, %p3194_p8 }
 0x13d   : > { %p2794_p11 = pneg %p2793_p3 }
 0x13f   : > { %p2799_p13 = pnand %p2797_p12, %p2794_p11 }
 0x141   : > { %2802 = shalt.err (!%p2799_p13)
}
 0x142   : > { %s2803_s15 = scalar_lea.vmem %s570_s2, 16  ;;  %s2810_s21 = scalar_lea.vmem %s570_s2, 32 }
 0x143   : > { %p2804_p0 = scmp.ne.s32.totalorder %s570_s2, %s2803_s15  ;;  %p2811_p7 = scmp.lt.s32.totalorder %s570_s2, %s570_s2 }
 0x144   : > { %p2812_p9 = scmp.lt.s32.totalorder %s2810_s21, %s2803_s15 }
 0x145   : > { %p2806_p2 = pnand %p2804_p0, %p3194_p8 }
 0x146   : > { %p2813_p5 = por %p2812_p9, %p2811_p7 }
 0x147   : > { %p2807_p4 = pneg %p2806_p2 }
 0x149   : > { %p2814_p10 = pnand %p2813_p5, %p2807_p4 }
 0x14b   : > { %2817 = shalt.err (!%p2814_p10)
}
 0x14c   : > { %s3878_s26 = sld [smem:[#allocation42_spill]]  ;;  %s3879_s1 = sld [smem:[#allocation41_spill]] }
 0x14d   : > { %s3880_s30 = sld [smem:[#allocation44_spill]]  ;;  %s2021_s14 = sadd.s32 4294967294, %s3024_s23  }
 0x14e   : > { %2342 = dma.hbm_to_vmem [thread:$0]  (!%p3178_p6), %s3835_s13, 16, %s570_s2, [#allocation26]  }
 0x14f   : > { %s56_s16 = sadd.s32 1, %s3020_s22  ;;  %s65_s28 = sadd.s32 1, %s3012_s20 }
 0x150   : > { %p58_p8 = scmp.ge.s32.totalorder %s56_s16, 2  ;;  %p73_p3 = scmp.eq.s32.totalorder %s3024_s23, 0 }
 0x151   : > { %p388_p7 = scmp.eq.s32.totalorder %s2021_s14, 1  ;;  %p2369_p5 = scmp.lt.s32.totalorder %s3024_s23, 2 }
 0x152   : > { %p72_p1 = scmp.ne.s32.totalorder %s3012_s20, %s3878_s26  ;;  %s3922_s16 = smov (%p58_p8, %s56_s16), 0 }
 0x153   : > { %p78_p12 = scmp.ne.s32.totalorder %s3878_s26, %s3879_s1  ;;  %s60_s2 = ssub.s32 %s3020_s22, %s3922_s16 }
 0x154   : > { %p3446_p11 = por %p73_p3, %p72_p1  ;;  %p382_p6 = scmp.eq.s32.totalorder %s3880_s30, 1 }
 0x155   : > { %p63_p13 = scmp.eq.s32.totalorder %s60_s2, 0  ;;  %p3882_p0 = scmp.eq.s32.totalorder %s3880_s30, 0 }
 0x156   : > { %p3461_p4 = por %p382_p6, %p72_p1  ;;  %p3468_p9 = por %p388_p7, %p78_p12 }
 0x157   : > { %p3457_p2 = por %p3882_p0, %p78_p12  ;;  %s3474_s24 = sand.u32 1, %s3012_s20  }
 0x158   : > { %s3884_s25 = scalar_select %p3461_p4, 1, 0 }
 0x159   : > { %s3466_s19 = scalar_select %p63_p13, %s3012_s20, %s65_s28  }
 0x15a   : > { %s3885_s29 = scalar_select %p3468_p9, 1, 0 }
 0x15b   : > { %s2037_s15 = sshll.u32 %s3020_s22, 7  ;;  %s2036_s21 = sshll.u32 %s3474_s24, 3 }
 0x15c   : > { %s3886_s26 = sld [smem:[#allocation46_spill]]  ;;  %s584_s30 = scalar_lea.vmem [#allocation4], %s2036_s21 }
 0x15d   : > { %s592_s14 = sshll.u32 %s584_s30, 4  ;;  %p3485_p10 = pnand %p2369_p5, %p3446_p11  ;;  %s3489_s14 = int_to_ptr.vmem [resolvable:$true] %s592_s14 }
 0x15e   : > { %s581_s3 = scalar_lea.sflag [#allocation5], %s3474_s24 }
 0x15f   : > { %p2820_p1 = pneg %p3485_p10 }
 0x162   : > { %s3481_s1 = scalar_lea.hbm %s3886_s26, %s2037_s15  ;;  %s2823_s21 = scalar_lea.hbm %s3886_s26, 256 }
 0x163   : > { %s2818_s0 = scalar_lea.hbm %s3481_s1, 128  ;;  %p2824_p11 = scmp.lt.u32.totalorder %s3481_s1, %s3886_s26 }
 0x164   : > { %p2819_p8 = scmp.ne.s32.totalorder %s3481_s1, %s2818_s0  ;;  %p2825_p6 = scmp.lt.u32.totalorder %s2823_s21, %s2818_s0 }
 0x165   : > { %p2827_p0 = scmp.lt.u32.totalorder %s2818_s0, %s3481_s1 }
 0x166   : > { %p2821_p3 = pnand %p2820_p1, %p2819_p8  ;;  %p2826_p13 = por %p2825_p6, %p2824_p11 }
 0x168   : > { %p2822_p12 = pneg %p2821_p3  ;;  %p2828_p7 = por %p2827_p0, %p2826_p13 }
 0x16a   : > { %p2829_p5 = pnand %p2828_p7, %p2822_p12 }
 0x16c   : > { %2832 = shalt.err (!%p2829_p5)
}
 0x16d   : > { %s2833_s2 = scalar_lea.vmem %s3489_s14, 128  ;;  %s3040_s15 = smov [#allocation4]  }
 0x16e   : > { %p2834_p8 = scmp.ne.s32.totalorder %s3489_s14, %s2833_s2  ;;  %s2838_s18 = sshll.u32 %s3040_s15, 4  ;;  %s2839_s18 = int_to_ptr.vmem [resolvable:$false] %s2838_s18 }
 0x16f   : > { %s2840_s27 = scalar_lea.vmem %s2839_s18, 256  ;;  %p2841_p4 = scmp.lt.s32.totalorder %s3489_s14, %s2839_s18 }
 0x170   : > { %p2836_p3 = pnand %p2834_p8, %p2820_p1  ;;  %p2842_p11 = scmp.lt.s32.totalorder %s2840_s27, %s2833_s2 }
 0x172   : > { %p2837_p9 = pneg %p2836_p3  ;;  %p2843_p6 = por %p2842_p11, %p2841_p4 }
 0x174   : > { %p2844_p13 = pnand %p2843_p6, %p2837_p9 }
 0x176   : > { %2847 = shalt.err (!%p2844_p13)
}
 0x177   : > { %2346 = dma.hbm_to_vmem [thread:$0]  (!%p3485_p10), %s3481_s1, 128, %s3489_s14, %s581_s3  }
 0x178   : > { %s2098_s0 = sshll.u32 %s3020_s22, 8  ;;  %s3888_s21 = sshll.u32 %s3474_s24, 4 }
 0x179   : > { %s603_s30 = scalar_lea.vmem [#allocation7], %s3888_s21  ;;  %s599_s18 = sand.u32 1, %s3024_s23  }
 0x17a   : > { %s610_s15 = sshll.u32 %s603_s30, 4  ;;  %s3889_s4 = sld [smem:[#allocation47_spill]]  ;;  %s3521_s15 = int_to_ptr.vmem [resolvable:$true] %s610_s15 }
 0x17b   : > { %s3529_s6 = scalar_lea.sflag [#allocation8], %s599_s18 }
 0x180   : > { %s3527_s5 = scalar_lea.hbm %s3889_s4, %s2098_s0  ;;  %s2853_s1 = scalar_lea.hbm %s3889_s4, 512 }
 0x181   : > { %s2848_s7 = scalar_lea.hbm %s3527_s5, 256  ;;  %p2854_p0 = scmp.lt.u32.totalorder %s3527_s5, %s3889_s4 }
 0x182   : > { %p2849_p4 = scmp.ne.s32.totalorder %s3527_s5, %s2848_s7  ;;  %p2855_p7 = scmp.lt.u32.totalorder %s2853_s1, %s2848_s7 }
 0x183   : > { %p2857_p8 = scmp.lt.u32.totalorder %s2848_s7, %s3527_s5 }
 0x184   : > { %p2851_p9 = pnand %p2849_p4, %p2820_p1  ;;  %p2856_p5 = por %p2855_p7, %p2854_p0 }
 0x186   : > { %p2852_p12 = pneg %p2851_p9  ;;  %p2858_p3 = por %p2857_p8, %p2856_p5 }
 0x188   : > { %p2859_p11 = pnand %p2858_p3, %p2852_p12 }
 0x18a   : > { %2862 = shalt.err (!%p2859_p11)
}
 0x18b   : > { %s2863_s0 = scalar_lea.vmem %s3521_s15, 256  ;;  %s3041_s30 = smov [#allocation7]  }
 0x18c   : > { %p2864_p6 = scmp.ne.s32.totalorder %s3521_s15, %s2863_s0  ;;  %s2868_s18 = sshll.u32 %s3041_s30, 4  ;;  %s2869_s18 = int_to_ptr.vmem [resolvable:$false] %s2868_s18 }
 0x18d   : > { %s2870_s2 = scalar_lea.vmem %s2869_s18, 512  ;;  %p2871_p9 = scmp.lt.s32.totalorder %s3521_s15, %s2869_s18 }
 0x18e   : > { %p2866_p13 = pnand %p2864_p6, %p2820_p1  ;;  %p2872_p0 = scmp.lt.s32.totalorder %s2870_s2, %s2863_s0 }
 0x190   : > { %p2867_p4 = pneg %p2866_p13  ;;  %p2873_p7 = por %p2872_p0, %p2871_p9 }
 0x192   : > { %p2874_p5 = pnand %p2873_p7, %p2867_p4 }
 0x194   : > { %2877 = shalt.err (!%p2874_p5)
}
 0x195   : > { %s3042_s7 = smov 128   ;;  %s3043_s27 = smov 8  }
 0x196   : > { %2349 = dma.hbm_to_vmem [thread:$0]  (!%p3485_p10), %s3527_s5, 256, %s3521_s15, %s3529_s6, %s3042_s7, %s3042_s7, %s3043_s27  }
 0x197   : > { %s3890_s3 = sld [smem:[#allocation45_spill]] }
 0x19d   : > { %p3891_p1 = scmp.ne.s32.totalorder %s3890_s3, 0 }
 0x19e   : > { %s3892_s24 = sld [smem:[#allocation42_spill]] (!%p3891_p1) }
 0x19f   : > { %622 = sbr.rel (%p3891_p1) target bundleno = 3318 (0xcf6), region = 76 }
 0x1a4   : > { %s3558_s1 = sand.u32 (!%p3891_p1), 1, %s3892_s24  }
 0x1a5   : > { %s3561_s14 = sshll.u32 (!%p3891_p1), %s3558_s1, 3  ;;  %s625_s21 = scalar_lea.sflag (!%p3891_p1), [#allocation5], %s3558_s1 }
 0x1a6   : > { %s628_s0 = scalar_lea.vmem [#allocation4], %s3561_s14 }
 0x1a7   : > { %2959 = dma.done.wait (%p3457_p2), %s625_s21, 128  }
 0x1a8   : > { %2961 = vsyncadd (%p3457_p2), %s625_s21, 4294967168  ;;  %s3893_s5 = sld [smem:[#allocation44_spill]]  ;;  %s2043_s28 = sshll.u32 %s3558_s1, 4 }
 0x1a9   : > { %s637_s30 = scalar_lea.vmem [#allocation7], %s2043_s28 }
 0x1ae   : > { %s633_s6 = sand.u32 1, %s3893_s5  }
 0x1af   : > { %s634_s15 = scalar_lea.sflag [#allocation8], %s633_s6 }
 0x1b0   : > { %2963 = dma.done.wait (%p3457_p2), %s634_s15, 256  }
 0x1b1   : > { %2965 = vsyncadd (%p3457_p2), %s634_s15, 4294967040  ;;  %p3894_p10 = scmp.eq.s32.totalorder %s3893_s5, 0 }
 0x1b3   : > { %2967 = dma.done.wait (%p3894_p10), [#allocation8], 192   ;;  %p3895_p12 = pmov %p3894_p10 }
 0x1b4   : > { %p3896_p8 = pmov %p3894_p10 }
 0x1b5   : > { %2969 = vsyncadd (%p3895_p12), [#allocation8], 4294967104 }
 0x1b6   : > { %2971 = dma.done.wait (%p3896_p8), [#allocation11], 272   ;;  %p3897_p3 = pmov %p3896_p8 }
 0x1b8   : > { %2973 = vsyncadd (%p3897_p3), [#allocation11], 4294967024  ;;  %p3898_p11 = pmov %p3897_p3 }
 0x1b9   : > { %p3899_p6 = pmov %p3897_p3 }
 0x1ba   : > { %2975 = dma.done.wait (%p3898_p11), [#allocation14], 272  }
 0x1bb   : > { %2977 = vsyncadd (%p3899_p6), [#allocation14], 4294967024  ;;  %p3900_p2 = pmov %p3897_p3 }
 0x1bd   : > { %2979 = dma.done.wait (%p3900_p2), [#allocation17], 272   ;;  %p3901_p13 = pmov %p3900_p2 }
 0x1be   : > { %p3902_p4 = pmov %p3900_p2 }
 0x1bf   : > { %2981 = vsyncadd (%p3901_p13), [#allocation17], 4294967024 }
 0x1c0   : > { %2983 = dma.done.wait (%p3902_p4), [#allocation20], 272   ;;  %p3903_p9 = pmov %p3900_p2 }
 0x1c1   : > { %p3904_p0 = pmov %p3900_p2 }
 0x1c2   : > { %2985 = vsyncadd (%p3903_p9), [#allocation20], 4294967024 }
 0x1c3   : > { %2987 = dma.done.wait (%p3904_p0), [#allocation23], 208   ;;  %p3905_p7 = pmov %p3904_p0 }
 0x1c4   : > { %p3906_p5 = pmov %p3904_p0 }
 0x1c5   : > { %2989 = vsyncadd (%p3905_p7), [#allocation23], 4294967088 }
 0x1c6   : > { %2991 = dma.done.wait (%p3906_p5), [#allocation26], 16   ;;  %p3907_p1 = pmov %p3904_p0 }
 0x1c7   : > { %v3044_v0 = vmov 0.0   ;;  %vm3045_vm0 = vmmov 0   ;;  %v2452_v1 = vld [vmem:[#allocation12] sm:$0xff]   ;;  %v2453_v2 = vld [vmem:[#allocation12 + $0x8] sm:$0xff]   ;;  %vm773_vm1 = vcmask 261120   ;;  %v2454_v5 = vld [vmem:[#allocation9] sm:$0xff]  }
 0x1c8   : > { %2993 = vsyncadd (%p3907_p1), [#allocation26], 4294967280  ;;  %2138 = vmatprep.subr.bf16.mxu0 %v3044_v0  ;;  %2142 = vmatprep.mubr.msk.bf16.mxu0 %vm3045_vm0, %v3044_v0  ;;  %v747_v3 = vld [vmem:[%s637_s30] sm:$0xff]  ;;  %v748_v4 = vld [vmem:[%s637_s30 + $0x8] sm:$0xff]  ;;  %vm911_vm2 = vcmask 1043456   ;;  %vm907_vm3 = vcmask 195584  }
 0x1c9   : > { %2146 = vmatprep.subr.bf16.mxu1 %v3044_v0  ;;  %2150 = vmatprep.mubr.msk.bf16.mxu1 %vm3045_vm0, %v3044_v0  ;;  %v749_v6 = vpack.c.bf16 %v748_v4, %v747_v3  ;;  %v2455_v7 = vld [vmem:[#allocation9 + $0x8] ss:$0 sps:$4 sm:$0xff]   ;;  %v886_v8 = vld [vmem:[%s628_s0] sm:$0xff]  ;;  %v2456_v11 = vld [vmem:[#allocation15] sm:$0xff]   ;;  %vm963_vm4 = vcmask 64512   ;;  %s3046_s17 = smov 120  }
 0x1ca   : > { %2139 = vmatpush3.bf16.msra.mxu0 %v2452_v1  ;;  %v913_v9 = vsel %vm911_vm2, %v2455_v7, 0  ;;  %v3618_v10 = vpack.c.bf16 %v886_v8, %v886_v8  ;;  %2147 = vmatpush3.bf16.msra.mxu1 %v2456_v11  ;;  %v2457_v12 = vld [vmem:[#allocation15 + $0x8] sm:$0xff]   ;;  %v2058_v13 = vld [vmem:[#allocation13] ss:$0 sm:$0xff]  ;;  %v2062_v31 = vld [vmem:[#allocation16] ss:$0 sm:$0xff] }
 0x1cb   : > { %2140 = vmatprep.subr.bf16.mxu0 %v3044_v0  ;;  %2148 = vmatprep.subr.bf16.mxu1 %v3044_v0  ;;  %v2066_v21 = vld [vmem:[#allocation10] ss:$0 sm:$0xff]  ;;  %vm1010_vm5 = vcmask 130048   ;;  %s3047_s18 = smov 112   ;;  %v960_v4 = vld [vmem:[#allocation18 + $0x4] sm:$0xf] }
 0x1cc   : > { %s3048_s2 = smov 104   ;;  %s741_s7 = scalar_lea.vmem [#allocation28], %s3561_s14 }
 0x1cd   : > { %s3908_s27 = sld [smem:[#allocation43_spill]]  ;;  %s3909_s0 = sld [smem:[#allocation55_spill]] }
 0x1ce   : > { %2141 = vmatpush3.bf16.msra.mxu0 %v2453_v2  ;;  %2149 = vmatpush3.bf16.msra.mxu1 %v2457_v12  ;;  %s1770_s6 = sshll.u32 %s741_s7, 4  ;;  %s1742_s28 = scalar_lea.sflag [#allocation29], %s3558_s1  ;;  %s1771_s6 = int_to_ptr.vmem [resolvable:$true] %s1770_s6 }
 0x1cf   : > { %2154 = vmatprep.subr.bf16.mxu0 %v3044_v0  ;;  %2162 = vmatprep.subr.bf16.mxu1 %v3044_v0  ;;  %s2878_s15 = scalar_lea.vmem %s1771_s6, 128  ;;  %p3910_p12 = scmp.ne.s32.totalorder %s3884_s25, 0 }
 0x1d0   : > { %p2879_p10 = scmp.ne.s32.totalorder %s1771_s6, %s2878_s15  ;;  %s3049_s30 = smov [#allocation28]  }
 0x1d1   : > { %2143 = vmatmul.mubr.msk.bf16.vlgmr.msra.gmra.mrb[0].mxu0 %vm773_vm1, %v749_v6  ;;  %2151 = vmatmul.mubr.msk.bf16.vlgmr.msra.gmra.mrb[0].mxu1 %vm773_vm1, %v749_v6 }
 0x1d2   : > { %2155 = vmatpush3.bf16.msra.mxu0 %v2454_v5  ;;  %2158 = vmatprep.mubr.msk.bf16.mxu0 %vm3045_vm0, %v3044_v0  ;;  %v1185_v5 = vsel %vm911_vm2, %v960_v4, 0  ;;  %p2880_p8 = pnand %p2879_p10, %p3910_p12 }
 0x1d3   : > { %2156 = vmatprep.subr.bf16.mxu0 %v3044_v0  ;;  %2164 = vmatprep.mubr.msk.bf16.mxu1 %vm3045_vm0, %v3044_v0  ;;  %s2094_s3 = sshll.u32 %s3908_s27, 7 }
 0x1d4   : > { %s3744_s5 = scalar_lea.hbm %s3909_s0, %s2094_s3  ;;  %p2881_p3 = pneg %p2880_p8 }
 0x1d6   : > { %2157 = vmatpush3.bf16.msra.mxu0 %v913_v9  ;;  %v959_v9 = vld [vmem:[#allocation18] sm:$0xf] }
 0x1d7   : > { %2168 = vmatprep.subr.bf16.mxu0 %v3044_v0 }
 0x1d9   : > { %2159 = vmatmul.mubr.msk.bf16.vlgmr.msra.gmra.mrb[4].mxu0 %vm907_vm3, %v3618_v10 }
 0x1da   : > { %2170 = vmatprep.mubr.msk.bf16.mxu0 %vm3045_vm0, %v3044_v0 }
 0x2a4   : > { %v811_v14 = vpop.f32.mrb[0].mxu0  ;;  %v875_v32 = vpop.f32.mrb[0].mxu1 }
 0x2a5   : > { %v2144_v15 = vpop.f32.mrb[1].mxu0  ;;  %v812_v17 = vadd.f32 %v2058_v13, %v811_v14  ;;  %v876_v33 = vadd.f32 %v2062_v31, %v875_v32  ;;  %v2152_v34 = vpop.f32.mrb[1].mxu1 }
 0x2a6   : > { %v814_v16 = vpop.f32.mrb[2].mxu0  ;;  %v878_v35 = vpop.f32.mrb[2].mxu1 }
 0x2a7   : > { %v815_v18 = vadd.f32 %v2058_v13, %v814_v16  ;;  %v2145_v19 = vpop.f32.mrb[3].mxu0  ;;  %v879_v36 = vadd.f32 %v2062_v31, %v878_v35  ;;  %v2153_v37 = vpop.f32.mrb[3].mxu1  ;;  %v1231_v13 = vsel %vm911_vm2, %v959_v9, 0 }
 0x2a9   : > { %v882_v20 = vpack.c.bf16 %v815_v18, %v812_v17  ;;  %v884_v38 = vpack.c.bf16 %v879_v36, %v876_v33 }
 0x2ab   : > { %883 = vst.msk [vmem:[#allocation2] sm:$0xff] %vm773_vm1, %v882_v20  ;;  %885 = vst.msk [vmem:[#allocation3] sm:$0xff] %vm773_vm1, %v884_v38 }
 0x2ac   : > { %v949_v22 = vpop.f32.mrb[4].mxu0 }
 0x2ad   : > { %v950_v23 = vadd.f32 %v2066_v21, %v949_v22  ;;  %v2160_v24 = vpop.f32.mrb[5].mxu0 }
 0x2ae   : > { %v952_v25 = vpop.f32.mrb[6].mxu0 }
 0x2af   : > { %v955_v26 = vmul.f32 0.35355338, %v950_v23  ;;  %v2161_v27 = vpop.f32.mrb[7].mxu0 }
 0x2b1   : > { %v3633_v29 = vpack.c.bf16 %v955_v26, %v955_v26 }
 0x2b2   : > { %v3631_v28 = vld [vmem:[#allocation2] sm:$0xff]  ;;  %v3647_v39 = vld [vmem:[#allocation3] sm:$0xff] }
 0x2b3   : > { %1072 = vrot.lane.b32.xlu0 %v3631_v28, %s3046_s17  ;;  %v968_v30 = vsel %vm963_vm4, %v3631_v28, 0  ;;  %2169 = vmatpush3.bf16.msra.mxu0 %v3647_v39 }
 0x2b4   : > { %2163 = vmatpush3.bf16.xpose.msra.mxu1 %v968_v30  ;;  %2180 = vmatprep.subr.bf16.mxu0 %v3044_v0 }
 0x2b5   : > { %2174 = vmatprep.subr.bf16.mxu1 %v3044_v0 }
 0x2b7   : > { %1069 = vrot.lane.b32.xlu0 %v3633_v29, %s3046_s17 }
 0x2bb   : > { %2165 = vmatmul.mubr.msk.bf16.vlgmr.msra.gmra.mrb[4].mxu1 %vm963_vm4, %v3633_v29 }
 0x2bc   : > { %2176 = vmatprep.mubr.msk.bf16.mxu1 %vm3045_vm0, %v3044_v0 }
 0x325   : > { %v1073_v40 = vpop.permute.xlu0 %1072 }
 0x326   : > { %v1078_v41 = vsel %vm963_vm4, %v1073_v40, 0 }
 0x327   : > { %2175 = vmatpush3.bf16.xpose.msra.mxu1 %v1078_v41 }
 0x328   : > { %2186 = vmatprep.subr.bf16.mxu1 %v3044_v0 }
 0x329   : > { %v1070_v42 = vpop.permute.xlu0 %1069 }
 0x32e   : > { %2177 = vmatmul.mubr.msk.bf16.vlgmr.msra.gmra.mrb[8].mxu1 %vm963_vm4, %v1070_v42 }
 0x32f   : > { %2188 = vmatprep.mubr.msk.bf16.mxu1 %vm3045_vm0, %v3044_v0  ;;  %2187 = vmatpush3.bf16.msra.mxu1 %v1185_v5 }
 0x330   : > { %2198 = vmatprep.subr.bf16.mxu1 %v3044_v0 }
 0x38e   : > { %v1004_v43 = vpop.f32.mrb[4].mxu1 }
 0x38f   : > { %v2166_v44 = vpop.f32.mrb[5].mxu1  ;;  %v1011_v45 = vsel %vm1010_vm5, %v1004_v43, -inf }
 0x390   : > { %1012 = vmax.xlane.f32.xlu1 %v1011_v45  ;;  %v1007_v46 = vpop.f32.mrb[6].mxu1 }
 0x391   : > { %v2167_v47 = vpop.f32.mrb[7].mxu1 }
 0x401   : > { %v1114_v48 = vpop.f32.mrb[8].mxu1 }
 0x402   : > { %v2178_v49 = vpop.f32.mrb[9].mxu1  ;;  %v1120_v50 = vsel %vm1010_vm5, %v1114_v48, -inf }
 0x403   : > { %1121 = vmax.xlane.f32.xlu1 %v1120_v50  ;;  %v1117_v51 = vpop.f32.mrb[10].mxu1 }
 0x404   : > { %v2179_v52 = vpop.f32.mrb[11].mxu1 }
 0x41d   : > { %v1013_v53 = vpop.xlane.xlu1 %1012 }
 0x41e   : > { %v1014_v54 = vsub.f32 %v1004_v43, %v1013_v53 }
 0x420   : > { %v1015_v55 = vmul.f32 1.442695, %v1014_v54 }
 0x422   : > { %2462 = vpow2.f32 %v1015_v55 }
 0x42c   : > { %v2463_v56 = vpop.eup %2462 }
 0x42d   : > { %v1017_v57 = vsel %vm1010_vm5, %v2463_v56, 0.0 }
 0x42e   : > { %1018 = vadd.xlane.f32.xlu0 %v1017_v57 }
 0x444   : > { %1336 = vrot.lane.b32.xlu0 %v3647_v39, %s3047_s18 }
 0x490   : > { %v1122_v58 = vpop.xlane.xlu1 %1121 }
 0x491   : > { %v1123_v59 = vsub.f32 %v1114_v48, %v1122_v58 }
 0x493   : > { %v1124_v60 = vmul.f32 1.442695, %v1123_v59 }
 0x495   : > { %2464 = vpow2.f32 %v1124_v60 }
 0x49f   : > { %v2465_v61 = vpop.eup %2464 }
 0x4a0   : > { %v1126_v62 = vsel %vm1010_vm5, %v2465_v61, 0.0 }
 0x4a1   : > { %1127 = vadd.xlane.f32.xlu1 %v1126_v62 }
 0x4b2   : > { %1134 = vrot.lane.b32.xlu1 %v3647_v39, %s3046_s17  ;;  %s2882_s17 = sshll.u32 %s3049_s30, 4  ;;  %s2883_s17 = int_to_ptr.vmem [resolvable:$false] %s2882_s17 }
 0x4b3   : > { %p2885_p11 = scmp.lt.s32.totalorder %s1771_s6, %s2883_s17 }
 0x4b6   : > { %1275 = vrot.lane.b32.xlu1 %v3631_v28, %s3047_s18 }
 0x4ba   : > { %1273 = vrot.lane.b32.xlu1 %v3633_v29, %s3047_s18  ;;  %s2884_s18 = scalar_lea.vmem %s2883_s17, 256 }
 0x4bb   : > { %v1019_v63 = vpop.xlane.xlu0 %1018  ;;  %p2886_p6 = scmp.lt.s32.totalorder %s2884_s18, %s2878_s15 }
 0x4bc   : > { %2466 = vrcp.f32 %v1019_v63 }
 0x4bd   : > { %p2887_p2 = por %p2886_p6, %p2885_p11 }
 0x4bf   : > { %v1337_v18 = vpop.permute.xlu0 %1336  ;;  %p2888_p13 = pnand %p2887_p2, %p2881_p3 }
 0x4c6   : > { %v2467_v1 = vpop.eup %2466 }
 0x4c7   : > { %v3665_v2 = vmul.f32 %v2467_v1, %v2463_v56 }
 0x4c9   : > { %v1023_v3 = vpack.c.bf16 %v3665_v2, %v3665_v2 }
 0x4cb   : > { %2171 = vmatmul.mubr.msk.bf16.vlgmr.msra.gmra.mrb[8].mxu0 %vm1010_vm5, %v1023_v3 }
 0x4cc   : > { %2182 = vmatprep.mubr.msk.bf16.mxu0 %vm3045_vm0, %v3044_v0 }
 0x52e   : > { %v1128_v6 = vpop.xlane.xlu1 %1127 }
 0x52f   : > { %2468 = vrcp.f32 %v1128_v6 }
 0x532   : > { %v1135_v7 = vpop.permute.xlu1 %1134 }
 0x533   : > { %2181 = vmatpush3.bf16.msra.mxu0 %v1135_v7 }
 0x534   : > { %2192 = vmatprep.subr.bf16.mxu0 %v3044_v0 }
 0x536   : > { %v1276_v20 = vpop.permute.xlu1 %1275 }
 0x537   : > { %v1281_v25 = vsel %vm963_vm4, %v1276_v20, 0 }
 0x539   : > { %v2469_v8 = vpop.eup %2468 }
 0x53a   : > { %v1130_v11 = vmul.f32 %v2469_v8, %v2465_v61  ;;  %v1274_v27 = vpop.permute.xlu1 %1273 }
 0x53c   : > { %v1132_v12 = vpack.c.bf16 %v1130_v11, %v1130_v11  ;;  %v1131_v52 = vadd.f32 %v1130_v11, %v3665_v2 }
 0x53e   : > { %2183 = vmatmul.mubr.msk.bf16.vlgmr.msra.gmra.mrb[12].mxu0 %vm1010_vm5, %v1132_v12  ;;  %v962_v12 = vld [vmem:[#allocation18 + $0xc] sm:$0xf] }
 0x53f   : > { %2193 = vmatpush3.bf16.msra.mxu0 %v1231_v13  ;;  %2194 = vmatprep.mubr.msk.bf16.mxu0 %vm3045_vm0, %v3044_v0  ;;  %v1544_v13 = vsel %vm911_vm2, %v962_v12, 0 }
 0x540   : > { %2204 = vmatprep.subr.bf16.mxu0 %v3044_v0 }
 0x59e   : > { %v1061_v14 = vpop.f32.mrb[8].mxu0 }
 0x59f   : > { %v1067_v15 = vpack.c.bf16 %v1061_v14, %v1061_v14  ;;  %v2172_v16 = vpop.f32.mrb[9].mxu0 }
 0x5a0   : > { %v1064_v17 = vpop.f32.mrb[10].mxu0 }
 0x5a1   : > { %v2173_v19 = vpop.f32.mrb[11].mxu0  ;;  %2195 = vmatmul.mubr.msk.bf16.vlgmr.msra.gmra.mrb[16].mxu0 %vm963_vm4, %v1067_v15 }
 0x5a2   : > { %2205 = vmatpush3.bf16.msra.mxu0 %v1337_v18  ;;  %2206 = vmatprep.mubr.msk.bf16.mxu0 %vm3045_vm0, %v3044_v0 }
 0x5a3   : > { %2216 = vmatprep.subr.bf16.mxu0 %v3044_v0 }
 0x611   : > { %v1174_v21 = vpop.f32.mrb[12].mxu0 }
 0x612   : > { %v1180_v22 = vpack.c.bf16 %v1174_v21, %v1174_v21  ;;  %v2184_v23 = vpop.f32.mrb[13].mxu0 }
 0x613   : > { %v1177_v24 = vpop.f32.mrb[14].mxu0 }
 0x614   : > { %v2185_v26 = vpop.f32.mrb[15].mxu0  ;;  %2189 = vmatmul.mubr.msk.bf16.vlgmr.msra.gmra.mrb[12].mxu1 %vm963_vm4, %v1180_v22 }
 0x615   : > { %2199 = vmatpush3.bf16.xpose.msra.mxu1 %v1281_v25  ;;  %2200 = vmatprep.mubr.msk.bf16.mxu1 %vm3045_vm0, %v3044_v0 }
 0x616   : > { %2210 = vmatprep.subr.bf16.mxu1 %v3044_v0 }
 0x61c   : > { %2201 = vmatmul.mubr.msk.bf16.vlgmr.msra.gmra.mrb[16].mxu1 %vm963_vm4, %v1274_v27 }
 0x61d   : > { %2212 = vmatprep.mubr.msk.bf16.mxu1 %vm3045_vm0, %v3044_v0 }
 0x674   : > { %v1267_v30 = vpop.f32.mrb[16].mxu0 }
 0x675   : > { %v2196_v31 = vpop.f32.mrb[17].mxu0 }
 0x676   : > { %v1270_v32 = vpop.f32.mrb[18].mxu0 }
 0x677   : > { %v2197_v33 = vpop.f32.mrb[19].mxu0  ;;  %v2458_v32 = vld [vmem:[#allocation21] sm:$0xff]  }
 0x678   : > { %v2459_v33 = vld [vmem:[#allocation21 + $0x8] sm:$0xff]  }
 0x6e7   : > { %v1221_v34 = vpop.f32.mrb[12].mxu1 }
 0x6e8   : > { %v3692_v35 = vadd.f32 %v1267_v30, %v1221_v34  ;;  %v2190_v36 = vpop.f32.mrb[13].mxu1  ;;  %v2460_v34 = vld [vmem:[#allocation24] sm:$0xff]  }
 0x6e9   : > { %v1224_v37 = vpop.f32.mrb[14].mxu1 }
 0x6ea   : > { %v2191_v38 = vpop.f32.mrb[15].mxu1 }
 0x6eb   : > { %v2082_v38 = vld [vmem:[#allocation19] ss:$0 sm:$0xff] }
 0x6ef   : > { %v1317_v40 = vpop.f32.mrb[16].mxu1 }
 0x6f0   : > { %v2202_v41 = vpop.f32.mrb[17].mxu1  ;;  %v1323_v42 = vsel %vm1010_vm5, %v1317_v40, -inf }
 0x6f1   : > { %1324 = vmax.xlane.f32.xlu1 %v1323_v42  ;;  %v1320_v43 = vpop.f32.mrb[18].mxu1 }
 0x6f2   : > { %v2203_v44 = vpop.f32.mrb[19].mxu1 }
 0x77e   : > { %v1325_v45 = vpop.xlane.xlu1 %1324 }
 0x77f   : > { %v1326_v46 = vsub.f32 %v1317_v40, %v1325_v45 }
 0x781   : > { %v1327_v47 = vmul.f32 1.442695, %v1326_v46 }
 0x783   : > { %2470 = vpow2.f32 %v1327_v47 }
 0x78d   : > { %v2471_v48 = vpop.eup %2470 }
 0x78e   : > { %v1329_v49 = vsel %vm1010_vm5, %v2471_v48, 0.0 }
 0x78f   : > { %1330 = vadd.xlane.f32.xlu0 %v1329_v49 }
 0x7a5   : > { %1432 = vrot.lane.b32.xlu0 %v3631_v28, %s3048_s2 }
 0x7a9   : > { %1430 = vrot.lane.b32.xlu0 %v3633_v29, %s3048_s2  ;;  %v961_v29 = vld [vmem:[#allocation18 + $0x8] sm:$0xf] }
 0x7aa   : > { %v1387_v58 = vsel %vm911_vm2, %v961_v29, 0 }
 0x7ab   : > { %2211 = vmatpush3.bf16.msra.mxu1 %v1387_v58 }
 0x7ac   : > { %2222 = vmatprep.subr.bf16.mxu1 %v3044_v0 }
 0x81c   : > { %v1331_v50 = vpop.xlane.xlu0 %1330 }
 0x81d   : > { %2472 = vrcp.f32 %v1331_v50 }
 0x820   : > { %v1433_v54 = vpop.permute.xlu0 %1432 }
 0x821   : > { %v1438_v57 = vsel %vm963_vm4, %v1433_v54, 0 }
 0x824   : > { %v1431_v28 = vpop.permute.xlu0 %1430 }
 0x827   : > { %v2473_v51 = vpop.eup %2472 }
 0x828   : > { %v1333_v53 = vmul.f32 %v2473_v51, %v2471_v48 }
 0x82a   : > { %v1334_v55 = vadd.f32 %v1333_v53, %v1131_v52  ;;  %v1335_v56 = vpack.c.bf16 %v1333_v53, %v1333_v53 }
 0x82c   : > { %2207 = vmatmul.mubr.msk.bf16.vlgmr.msra.gmra.mrb[20].mxu0 %vm1010_vm5, %v1335_v56 }
 0x82d   : > { %2217 = vmatpush3.bf16.xpose.msra.mxu0 %v1438_v57  ;;  %2218 = vmatprep.mubr.msk.bf16.mxu0 %vm3045_vm0, %v3044_v0 }
 0x82e   : > { %2228 = vmatprep.subr.bf16.mxu0 %v3044_v0 }
 0x834   : > { %2219 = vmatmul.mubr.msk.bf16.vlgmr.msra.gmra.mrb[24].mxu0 %vm963_vm4, %v1431_v28 }
 0x835   : > { %2230 = vmatprep.mubr.msk.bf16.mxu0 %vm3045_vm0, %v3044_v0  ;;  %2229 = vmatpush3.bf16.msra.mxu0 %v1544_v13 }
 0x836   : > { %2242 = vmatprep.subr.bf16.mxu0 %v3044_v0 }
 0x8ff   : > { %v1376_v59 = vpop.f32.mrb[20].mxu0 }
 0x900   : > { %v1382_v60 = vpack.c.bf16 %v1376_v59, %v1376_v59  ;;  %v2208_v61 = vpop.f32.mrb[21].mxu0 }
 0x901   : > { %v1379_v62 = vpop.f32.mrb[22].mxu0 }
 0x902   : > { %v2209_v63 = vpop.f32.mrb[23].mxu0  ;;  %2213 = vmatmul.mubr.msk.bf16.vlgmr.msra.gmra.mrb[20].mxu1 %vm963_vm4, %v1382_v60 }
 0x903   : > { %2224 = vmatprep.mubr.msk.bf16.mxu1 %vm3045_vm0, %v3044_v0 }
 0x907   : > { %v1474_v1 = vpop.f32.mrb[24].mxu0 }
 0x908   : > { %v2220_v2 = vpop.f32.mrb[25].mxu0  ;;  %v1480_v3 = vsel %vm1010_vm5, %v1474_v1, -inf }
 0x909   : > { %1481 = vmax.xlane.f32.xlu0 %v1480_v3  ;;  %v1477_v4 = vpop.f32.mrb[26].mxu0 }
 0x90a   : > { %v2221_v5 = vpop.f32.mrb[27].mxu0 }
 0x996   : > { %v1482_v6 = vpop.xlane.xlu0 %1481 }
 0x997   : > { %v1483_v7 = vsub.f32 %v1474_v1, %v1482_v6 }
 0x999   : > { %v1484_v8 = vmul.f32 1.442695, %v1483_v7 }
 0x99b   : > { %2474 = vpow2.f32 %v1484_v8 }
 0x9a5   : > { %v2475_v9 = vpop.eup %2474 }
 0x9a6   : > { %v1486_v11 = vsel %vm1010_vm5, %v2475_v9, 0.0 }
 0x9a7   : > { %1487 = vadd.xlane.f32.xlu1 %v1486_v11 }
 0x9b8   : > { %1493 = vrot.lane.b32.xlu1 %v3647_v39, %s3048_s2 }
 0x9d5   : > { %v1423_v14 = vpop.f32.mrb[20].mxu1 }
 0x9d6   : > { %v1429_v15 = vadd.f32 %v1423_v14, %v3692_v35  ;;  %v2214_v16 = vpop.f32.mrb[21].mxu1  ;;  %v2461_v35 = vld [vmem:[#allocation24 + $0x8] ss:$0 sps:$4 sm:$0xff]  }
 0x9d7   : > { %v1426_v17 = vpop.f32.mrb[22].mxu1  ;;  %v1691_v36 = vsel %vm911_vm2, %v2461_v35, 0 }
 0x9d8   : > { %v2215_v18 = vpop.f32.mrb[23].mxu1 }
 0xa34   : > { %v1488_v19 = vpop.xlane.xlu1 %1487 }
 0xa35   : > { %2476 = vrcp.f32 %v1488_v19 }
 0xa38   : > { %v1494_v20 = vpop.permute.xlu1 %1493 }
 0xa39   : > { %2223 = vmatpush3.bf16.msra.mxu1 %v1494_v20 }
 0xa3a   : > { %2234 = vmatprep.subr.bf16.mxu1 %v3044_v0 }
 0xa3f   : > { %v2477_v39 = vpop.eup %2476 }
 0xa40   : > { %v1490_v21 = vmul.f32 %v2477_v39, %v2475_v9 }
 0xa42   : > { %v1491_v22 = vadd.f32 %v1490_v21, %v1334_v55  ;;  %v1492_v23 = vpack.c.bf16 %v1490_v21, %v1490_v21 }
 0xa44   : > { %2225 = vmatmul.mubr.msk.bf16.vlgmr.msra.gmra.mrb[24].mxu1 %vm1010_vm5, %v1492_v23  ;;  %v1587_v24 = vmul.f32 0.25, %v1491_v22 }
 0xa45   : > { %2238 = vmatprep.mubr.msk.bf16.mxu1 %vm3045_vm0, %v3044_v0  ;;  %2235 = vmatpush3.bf16.msra.mxu1 %v2458_v32 }
 0xa46   : > { %1588 = vst.msk [vmem:[%s741_s7] sm:$0xff] %vm1010_vm5, %v1587_v24  ;;  %2236 = vmatprep.subr.bf16.mxu1 %v3044_v0 }
 0xa49   : > { %2237 = vmatpush3.bf16.msra.mxu1 %v2459_v33 }
 0xb17   : > { %v1533_v25 = vpop.f32.mrb[24].mxu1 }
 0xb18   : > { %v1539_v26 = vpack.c.bf16 %v1533_v25, %v1533_v25  ;;  %v2226_v27 = vpop.f32.mrb[25].mxu1 }
 0xb19   : > { %v1536_v30 = vpop.f32.mrb[26].mxu1 }
 0xb1a   : > { %v2227_v31 = vpop.f32.mrb[27].mxu1  ;;  %2231 = vmatmul.mubr.msk.bf16.vlgmr.msra.gmra.mrb[28].mxu0 %vm963_vm4, %v1539_v26 }
 0xb1b   : > { %2246 = vmatprep.mubr.msk.bf16.mxu0 %vm3045_vm0, %v3044_v0  ;;  %2243 = vmatpush3.bf16.msra.mxu0 %v2460_v34 }
 0xb1c   : > { %2244 = vmatprep.subr.bf16.mxu0 %v3044_v0 }
 0xb1f   : > { %2245 = vmatpush3.bf16.msra.mxu0 %v1691_v36 }
 0xb22   : > { %2247 = vmatmul.mubr.msk.bf16.vlgmr.msra.gmra.mrb[32].mxu0 %vm907_vm3, %v3618_v10 }
 0xbed   : > { %v1580_v37 = vpop.f32.mrb[28].mxu0 }
 0xbee   : > { %v1586_v40 = vadd.f32 %v1580_v37, %v1429_v15  ;;  %v2232_v41 = vpop.f32.mrb[29].mxu0 }
 0xbef   : > { %v1583_v42 = vpop.f32.mrb[30].mxu0 }
 0xbf0   : > { %v1596_v43 = vadd.f32 %v2082_v38, %v1586_v40  ;;  %v2233_v44 = vpop.f32.mrb[31].mxu0 }
 0xbf2   : > { %v1597_v45 = vpack.c.bf16 %v1596_v43, %v1596_v43 }
 0xbf4   : > { %2239 = vmatmul.mubr.msk.bf16.vlgmr.msra.gmra.mrb[28].mxu1 %vm773_vm1, %v1597_v45 }
 0xbf5   : > { %v1727_v0 = vpop.f32.mrb[32].mxu0 }
 0xbf6   : > { %v2248_v46 = vpop.f32.mrb[33].mxu0 }
 0xbf7   : > { %v1730_v47 = vpop.f32.mrb[34].mxu0 }
 0xbf8   : > { %v2249_v48 = vpop.f32.mrb[35].mxu0 }
 0xbf9   : > { %2891 = shalt.err (!%p2888_p13)
}
 0xbfa   : > { %s2892_s2 = scalar_lea.hbm %s3744_s5, 128  ;;  %s2896_s21 = scalar_lea.hbm %s3909_s0, 256 }
 0xbfb   : > { %p2893_p4 = scmp.ne.s32.totalorder %s3744_s5, %s2892_s2  ;;  %p2897_p7 = scmp.lt.u32.totalorder %s3744_s5, %s3909_s0 }
 0xbfc   : > { %p2898_p5 = scmp.lt.u32.totalorder %s2896_s21, %s2892_s2  ;;  %p2900_p10 = scmp.lt.u32.totalorder %s2892_s2, %s3744_s5 }
 0xbfd   : > { %p2894_p9 = pnand %p2893_p4, %p3910_p12 }
 0xbfe   : > { %p2899_p1 = por %p2898_p5, %p2897_p7 }
 0xbff   : > { %p2895_p0 = pneg %p2894_p9 }
 0xc00   : > { %p2901_p8 = por %p2900_p10, %p2899_p1 }
 0xc02   : > { %p2902_p3 = pnand %p2901_p8, %p2895_p0 }
 0xc04   : > { %2905 = shalt.err (!%p2902_p3)
}
 0xc05   : > { %2303 = dma.vmem_to_hbm [thread:$0]  (%p3910_p12), %s1771_s6, 128, %s3744_s5, %s1742_s28   ;;  %v2083_v10 = vld [vmem:[#allocation22] ss:$0 sm:$0xff]  ;;  %v2088_v57 = vld [vmem:[#allocation25] ss:$0 sm:$0xff] }
 0xc06   : > { %v1728_v28 = vadd.f32 %v2088_v57, %v1727_v0  ;;  %s734_s15 = scalar_lea.vmem [#allocation27], %s3561_s14  ;;  %s3911_s28 = sld [smem:[#allocation54_spill]] }
 0xc07   : > { %s1756_s18 = sshll.u32 %s734_s15, 4  ;;  %s1737_s7 = scalar_lea.sflag [#allocation6], %s3558_s1  ;;  %s3774_s18 = int_to_ptr.vmem [resolvable:$true] %s1756_s18 }
 0xc08   : > { %s2906_s24 = scalar_lea.vmem %s3774_s18, 128  ;;  %s3050_s14 = smov [#allocation27]  }
 0xc09   : > { %p2907_p11 = scmp.ne.s32.totalorder %s3774_s18, %s2906_s24  ;;  %s2910_s27 = sshll.u32 %s3050_s14, 4  ;;  %s2911_s27 = int_to_ptr.vmem [resolvable:$false] %s2910_s27 }
 0xc0a   : > { %s2912_s21 = scalar_lea.vmem %s2911_s27, 256  ;;  %p2913_p13 = scmp.lt.s32.totalorder %s3774_s18, %s2911_s27 }
 0xc0b   : > { %p2908_p6 = pnand %p2907_p11, %p3910_p12  ;;  %p2914_p4 = scmp.lt.s32.totalorder %s2912_s21, %s2906_s24 }
 0xc0c   : > { %s3772_s2 = scalar_lea.hbm %s3911_s28, %s2094_s3 }
 0xc0d   : > { %p2909_p2 = pneg %p2908_p6  ;;  %p2915_p9 = por %p2914_p4, %p2913_p13 }
 0xc0f   : > { %p2916_p0 = pnand %p2915_p9, %p2909_p2 }
 0xcc7   : > { %v1659_v49 = vpop.f32.mrb[28].mxu1 }
 0xcc8   : > { %v1660_v50 = vadd.f32 %v2083_v10, %v1659_v49  ;;  %v2240_v51 = vpop.f32.mrb[29].mxu1 }
 0xcc9   : > { %v1662_v52 = vpop.f32.mrb[30].mxu1 }
 0xcca   : > { %v2087_v53 = vmul.f32 -1.442695, %v1660_v50  ;;  %v2241_v54 = vpop.f32.mrb[31].mxu1 }
 0xccc   : > { %2478 = vpow2.f32 %v2087_v53 }
 0xcd6   : > { %v2479_v55 = vpop.eup %2478 }
 0xcd7   : > { %v1668_v56 = vadd.f32 1.0, %v2479_v55 }
 0xcd9   : > { %2480 = vrcp.f32 %v1668_v56 }
 0xce3   : > { %v2481_v29 = vpop.eup %2480 }
 0xce4   : > { %v1733_v58 = vmul.f32 %v2481_v29, %v1596_v43 }
 0xce6   : > { %v1734_v59 = vadd.f32 %v1733_v58, %v1728_v28 }
 0xce8   : > { %1735 = vst.msk [vmem:[%s734_s15] sm:$0xff] %vm773_vm1, %v1734_v59 }
 0xce9   : > { %2919 = shalt.err (!%p2916_p0)
}
 0xcea   : > { %s2920_s1 = scalar_lea.hbm %s3772_s2, 128  ;;  %s2924_s17 = scalar_lea.hbm %s3911_s28, 256 }
 0xceb   : > { %p2921_p7 = scmp.ne.s32.totalorder %s3772_s2, %s2920_s1  ;;  %p2925_p10 = scmp.lt.u32.totalorder %s3772_s2, %s3911_s28 }
 0xcec   : > { %p2926_p8 = scmp.lt.u32.totalorder %s2924_s17, %s2920_s1  ;;  %p2928_p11 = scmp.lt.u32.totalorder %s2920_s1, %s3772_s2 }
 0xced   : > { %p2922_p5 = pnand %p2921_p7, %p3910_p12 }
 0xcee   : > { %p2927_p3 = por %p2926_p8, %p2925_p10 }
 0xcef   : > { %p2923_p1 = pneg %p2922_p5 }
 0xcf0   : > { %p2929_p6 = por %p2928_p11, %p2927_p3 }
 0xcf2   : > { %p2930_p2 = pnand %p2929_p6, %p2923_p1 }
 0xcf4   : > { %2933 = shalt.err (!%p2930_p2)
}
 0xcf5   : > { %2302 = dma.vmem_to_hbm [thread:$0]  (%p3910_p12), %s3774_s18, 128, %s3772_s2, %s1737_s7  }
 0xcf6 PF: > { %s3912_s6 = sld [smem:[#allocation41_spill]]  ;;  %p3913_p13 = scmp.ne.s32.totalorder %s3885_s29, 0 }
 0xcf7   : > { %p3914_p4 = scmp.ge.s32.totalorder %s3024_s23, 2 }
 0xcf9   : > { %p2351_p9 = pnand %p3914_p4, %p3913_p13 }
 0xcfc   : > { %s1782_s24 = sand.u32 1, %s3912_s6  }
 0xcfd   : > { %s1783_s14 = scalar_lea.sflag [#allocation6], %s1782_s24 }
 0xcfe   : > { %2995 = dma.done.wait (!%p2351_p9), %s1783_s14, 128  }
 0xcff   : > { %2997 = vsyncadd (!%p2351_p9), %s1783_s14, 4294967168  ;;  %s1792_s27 = scalar_lea.sflag [#allocation29], %s1782_s24 }
 0xd00   : > { %2999 = dma.done.wait (!%p2351_p9), %s1792_s27, 128  }
 0xd01   : > { %3001 = vsyncadd (!%p2351_p9), %s1792_s27, 4294967168  ;;  %s44_s23 = sadd.s32 1, %s3024_s23   ;;  %s3915_s18 = sld [smem:[#allocation42_spill]] }
 0xd02   : > { %p41_p0 = scmp.ge.s32.totalorder %s44_s23, 4   ;;  %s3916_s25 = smov %s3466_s19 }
 0xd03   : > { %s3917_s19 = smov %s3012_s20  ;;  %s3918_s20 = smov %s3916_s25 }
 0xd04   : > { %s3919_s21 = smov %s3020_s22  ;;  %s3920_s22 = smov %s3922_s16 }
 0xd05   :  { %43 = sbr.rel (!%p41_p0) target bundleno = 27 (0x1b), region = 203 }
 0xd0c   :  { %1797 = vsyncpa [#allocation5], 1 }
 0xd0d   :  { %1799 = vsyncpa [#allocation5 + $0x1], 1 }
 0xd0e   :  { %1800 = vsyncpa [#allocation8], 1 }
 0xd0f   :  { %1802 = vsyncpa [#allocation8 + $0x1], 1 }
 0xd10   :  { %1803 = vsyncpa [#allocation11], 1 }
 0xd11   :  { %1804 = vsyncpa [#allocation14], 1 }
 0xd12   :  { %1805 = vsyncpa [#allocation17], 1 }
 0xd13   :  { %1806 = vsyncpa [#allocation20], 1 }
 0xd14   :  { %1807 = vsyncpa [#allocation23], 1 }
 0xd15   :  { %1808 = vsyncpa [#allocation26], 1 }
 0xd16   :  { %1809 = vsyncpa [#allocation6], 1 }
 0xd17   :  { %1811 = vsyncpa [#allocation6 + $0x1], 1 }
 0xd18   :  { %1812 = vsyncpa [#allocation29], 1 }
 0xd19   :  { %1814 = vsyncpa [#allocation29 + $0x1], 1 }

</bundles_post_ra>
